<compile_context>
chip_gen: v6e
topology: v6e:2x2x1
jax: 0.10.0
libtpu: 0.0.40
codegen_flags: <defaults>
</compile_context>

<pallas_src>
import math
import jax
import jax.numpy as jnp
from jax import lax
from jax.experimental import pallas as pl
from jax.experimental.pallas import tpu as pltpu


# --------------------------------- in-kernel building blocks ---------------------------------
def _mha_body(xq, kv, w_refs, n_heads, mask_bias):
    """Multi-head attention on one batch element.

    xq: (Sq, D) f32, kv: (Sk, D) f32.  w_refs = (wq, bq, wk, bk, wv, bv, wo, bo) refs with bf16
    weight matrices and f32 (1, D) biases.  mask_bias: None or (Sq, Sk) f32 additive bias.
    Returns (Sq, D) f32.
    """
    wq, bq, wk, bk, wv, bv, wo, bo = (r[...] for r in w_refs)
    D = xq.shape[-1]
    dh = D // n_heads

    xq_b = xq.astype(jnp.bfloat16)
    kv_b = kv.astype(jnp.bfloat16)

    # Projections: bf16 MXU operands, f32 accumulation; 1/sqrt(dh) folded into q once.
    q = jnp.dot(xq_b, wq, preferred_element_type=jnp.float32) + bq
    k = jnp.dot(kv_b, wk, preferred_element_type=jnp.float32) + bk
    v = jnp.dot(kv_b, wv, preferred_element_type=jnp.float32) + bv
    q = q * (1.0 / math.sqrt(dh))

    heads = []
    for h in range(n_heads):                         # static unroll, n_heads is small
        sl = slice(h * dh, (h + 1) * dh)
        qh = q[:, sl].astype(jnp.bfloat16)           # (Sq, dh)
        kh = k[:, sl].astype(jnp.bfloat16)           # (Sk, dh)
        vh = v[:, sl].astype(jnp.bfloat16)           # (Sk, dh)
        s = lax.dot_general(qh, kh, (((1,), (1,)), ((), ())),
                            preferred_element_type=jnp.float32)      # (Sq, Sk) f32
        if mask_bias is not None:
            s = s + mask_bias                        # hoisted mask: one add per head
        m = jnp.max(s, axis=-1, keepdims=True)
        e = jnp.exp(s - m)
        w = e * pl.reciprocal(jnp.sum(e, axis=-1, keepdims=True), approx=True)
        heads.append(jnp.dot(w.astype(jnp.bfloat16), vh,
                             preferred_element_type=jnp.float32))
    attn = jnp.concatenate(heads, axis=-1)           # (Sq, D) kept in registers (no VMEM scratch)
    return jnp.dot(attn.astype(jnp.bfloat16), wo, preferred_element_type=jnp.float32) + bo


def _addnorm(x, y):
    # PyTorch AddNorm: nn.LayerNorm(x.shape[1:]) constructed fresh each forward (unit affine):
    # scalar mean / biased variance over the whole (S, D) slab of this batch element, f32.
    s = x + y
    mean = jnp.mean(s)
    var = jnp.mean((s - mean) ** 2)
    return (s - mean) * lax.rsqrt(var + 1e-5)


def _make_decoder_block_kernel(n_heads: int, cross_masked: bool):
    def kernel(vlen_ref, x_ref, kv_ref, enc_ref, *rest):
        (wq1, bq1, wk1, bk1, wv1, bv1, wo1, bo1,
         wq2, bq2, wk2, bk2, wv2, bv2, wo2, bo2,
         w1_ref, b1_ref, w2_ref, b2_ref, o_ref) = rest

        b = pl.program_id(0)
        x = x_ref[0]                                 # (Sq, D) f32
        kv = kv_ref[0]                               # (Sk, D) f32
        enc = enc_ref[0]                             # (Se, D) f32
        Sq = x.shape[0]
        Se = enc.shape[0]

        # ---- self-attention over [cache ; x] (inference: no causal mask) + AddNorm ----
        y = _mha_body(x, kv, (wq1, bq1, wk1, bk1, wv1, bv1, wo1, bo1), n_heads, None)
        x = _addnorm(x, y)

        # ---- cross-attention over encoder outputs with valid-length mask + AddNorm ----
        if cross_masked:
            vlen = vlen_ref[b]
            col = lax.broadcasted_iota(jnp.int32, (Sq, Se), 1)
            mask_bias = jnp.where(col < vlen, 0.0, -1000000.0).astype(jnp.float32)
        else:
            mask_bias = None
        y = _mha_body(x, enc, (wq2, bq2, wk2, bk2, wv2, bv2, wo2, bo2), n_heads, mask_bias)
        x = _addnorm(x, y)

        # ---- position-wise FFN + AddNorm ----
        h = jnp.dot(x.astype(jnp.bfloat16), w1_ref[...],
                    preferred_element_type=jnp.float32) + b1_ref[...]
        h = jnp.maximum(h, 0.0)
        y = jnp.dot(h.astype(jnp.bfloat16), w2_ref[...],
                    preferred_element_type=jnp.float32) + b2_ref[...]
        o_ref[0] = _addnorm(x, y)

    return kernel


# ------------------------------------- host-side wrapper -------------------------------------
def fused_decoder_block(bp, x, key_values, enc_outputs, enc_valid_lens, n_heads,
                        vmem_limit_bytes=64 * 1024 * 1024):
    """out = AddNorm(AddNorm(AddNorm(x + selfMHA) + crossMHA) + FFN); single pallas_call."""
    B, Sq, D = x.shape
    Sk = key_values.shape[1]
    Se = enc_outputs.shape[1]

    masked = enc_valid_lens is not None
    vlens = (enc_valid_lens.astype(jnp.int32) if masked
             else jnp.zeros((B,), jnp.int32))        # dummy, never read when masked=False

    def full(arr):
        n = arr.ndim
        return pl.BlockSpec(arr.shape, lambda b, vl, _n=n: (0,) * _n)

    def per_b(S):
        return pl.BlockSpec((1, S, D), lambda b, vl: (b, 0, 0))

    a1, a2, f = bp["attn1"], bp["attn2"], bp["ffn"]
    weight_args = (
        a1["wq"], a1["bq"], a1["wk"], a1["bk"], a1["wv"], a1["bv"], a1["wo"], a1["bo"],
        a2["wq"], a2["bq"], a2["wk"], a2["bk"], a2["wv"], a2["bv"], a2["wo"], a2["bo"],
        f["w1"], f["b1"], f["w2"], f["b2"],
    )

    return pl.pallas_call(
        _make_decoder_block_kernel(n_heads, masked),
        out_shape=jax.ShapeDtypeStruct((B, Sq, D), jnp.float32),
        grid_spec=pltpu.PrefetchScalarGridSpec(
            num_scalar_prefetch=1,
            grid=(B,),
            in_specs=[per_b(Sq), per_b(Sk), per_b(Se)] + [full(w) for w in weight_args],
            out_specs=per_b(Sq),
        ),
        compiler_params=pltpu.CompilerParams(
            dimension_semantics=("parallel",),
            vmem_limit_bytes=vmem_limit_bytes,
        ),
    )(vlens, x, key_values, enc_outputs, *weight_args)


def prepare_block_params(params):
    """Pre-cast matmul weights to bf16 and reshape biases to (1, N) ONCE (feedback: avoids a
    per-step f32->bf16 convert + extra weight HBM copy on every forward)."""
    bf = jnp.bfloat16

    def mha(p):
        D = p["wq"].shape[0]
        return dict(
            wq=p["wq"].astype(bf), bq=p["bq"].reshape(1, D),
            wk=p["wk"].astype(bf), bk=p["bk"].reshape(1, D),
            wv=p["wv"].astype(bf), bv=p["bv"].reshape(1, D),
            wo=p["wo"].astype(bf), bo=p["bo"].reshape(1, D),
        )

    f = params["ffn"]
    H = f["w1"].shape[1]
    D = f["w2"].shape[1]
    return dict(
        attn1=mha(params["attn1"]),
        attn2=mha(params["attn2"]),
        ffn=dict(w1=f["w1"].astype(bf), b1=f["b1"].reshape(1, H),
                 w2=f["w2"].astype(bf), b2=f["b2"].reshape(1, D)),
    )


# ---------------------------------- DecoderTransformerBlock forward ----------------------------------
def decoder_block_forward(block_params, x, state, layer_i, n_heads):
    enc_outputs, enc_valid_lens, caches = state
    cache = caches[layer_i]
    # TODO(synk): in-kernel KV-cache update (preallocated max-length cache + input_output_aliases)
    # would remove this O(cache_len) host-side HBM copy per decode step.
    key_values = x if cache is None else jnp.concatenate([cache, x], axis=1)
    caches = list(caches)
    caches[layer_i] = key_values

    out = fused_decoder_block(block_params, x, key_values, enc_outputs, enc_valid_lens, n_heads)
    return out, (enc_outputs, enc_valid_lens, caches)


# ---------------------------------------- parameter init ----------------------------------------
def _linear_init(key, fan_in, fan_out):
    kw, kb = jax.random.split(key)
    bound = 1.0 / math.sqrt(fan_in)
    w = jax.random.uniform(kw, (fan_in, fan_out), jnp.float32, -bound, bound)
    b = jax.random.uniform(kb, (fan_out,), jnp.float32, -bound, bound)
    return w, b


def init_params(key, d_model, n_heads, hidden_dim):
    keys = jax.random.split(key, 10)

    def mha_params(ks):
        wq, bq = _linear_init(ks[0], d_model, d_model)
        wk, bk = _linear_init(ks[1], d_model, d_model)
        wv, bv = _linear_init(ks[2], d_model, d_model)
        wo, bo = _linear_init(ks[3], d_model, d_model)
        return dict(wq=wq, bq=bq, wk=wk, bk=bk, wv=wv, bv=bv, wo=wo, bo=bo)

    w1, b1 = _linear_init(keys[8], d_model, hidden_dim)
    w2, b2 = _linear_init(keys[9], hidden_dim, d_model)
    return dict(
        attn1=mha_params(keys[0:4]),
        attn2=mha_params(keys[4:8]),
        ffn=dict(w1=w1, b1=b1, w2=w2, b2=b2),
    )


# ---------------------------------------- pure-JAX f32 reference ----------------------------------------
def _ref_mha(p, Q, K, V, valid_lens, n_heads):
    B, Sq, D = Q.shape
    Sk = K.shape[1]
    dh = D // n_heads

    def tr(x):
        S = x.shape[1]
        return x.reshape(B, S, n_heads, dh).transpose(0, 2, 1, 3).reshape(B * n_heads, S, dh)

    q = tr(Q @ p["wq"] + p["bq"])
    k = tr(K @ p["wk"] + p["bk"])
    v = tr(V @ p["wv"] + p["bv"])
    scores = jnp.einsum("bqd,bkd->bqk", q, k) / math.sqrt(dh)
    if valid_lens is not None:
        vl = jnp.repeat(valid_lens, n_heads)
        mask = jnp.arange(Sk)[None, None, :] < vl[:, None, None]
        scores = jnp.where(mask, scores, -1000000.0)
    w = jax.nn.softmax(scores, axis=-1)
    o = jnp.einsum("bqk,bkd->bqd", w, v)
    o = o.reshape(B, n_heads, Sq, dh).transpose(0, 2, 1, 3).reshape(B, Sq, D)
    return o @ p["wo"] + p["bo"]


def _ref_addnorm(x, y):
    s = x + y
    mean = jnp.mean(s, axis=(1, 2), keepdims=True)
    var = jnp.mean((s - mean) ** 2, axis=(1, 2), keepdims=True)
    return (s - mean) / jnp.sqrt(var + 1e-5)


def ref_forward(params, x, state, layer_i, n_heads):
    enc_outputs, enc_valid_lens, caches = state
    cache = caches[layer_i]
    kv = x if cache is None else jnp.concatenate([cache, x], axis=1)
    y = _ref_mha(params["attn1"], x, kv, kv, None, n_heads)
    x = _ref_addnorm(x, y)
    y = _ref_mha(params["attn2"], x, enc_outputs, enc_outputs, enc_valid_lens, n_heads)
    x = _ref_addnorm(x, y)
    h = jnp.maximum(x @ params["ffn"]["w1"] + params["ffn"]["b1"], 0.0)
    y = h @ params["ffn"]["w2"] + params["ffn"]["b2"]
    return _ref_addnorm(x, y)


# ----------------------------------------------- main -----------------------------------------------
if __name__ == "__main__":
    B, S_dec, S_cache, S_enc = 2, 8, 4, 10
    d_model, n_heads, hidden_dim = 32, 4, 64

    root = jax.random.PRNGKey(0)
    kp, kx, kc, ke = jax.random.split(root, 4)

    params = init_params(kp, d_model, n_heads, hidden_dim)
    block_params = prepare_block_params(params)      # bf16 weight cast / bias reshape happens ONCE
    x = jax.random.normal(kx, (B, S_dec, d_model), jnp.float32)
    cached_kv = jax.random.normal(kc, (B, S_cache, d_model), jnp.float32)
    enc_outputs = jax.random.normal(ke, (B, S_enc, d_model), jnp.float32)
    enc_valid_lens = jnp.array([7, 10], dtype=jnp.int32)

    state = (enc_outputs, enc_valid_lens, [cached_kv])

    out, new_state = decoder_block_forward(block_params, x, state, layer_i=0, n_heads=n_heads)
    out = jax.block_until_ready(out)

    ref = ref_forward(params, x, state, 0, n_heads)
    assert out.shape == (B, S_dec, d_model)
    assert new_state[2][0].shape == (B, S_cache + S_dec, d_model)
    # bf16 MXU operands in the kernel vs. pure-f32 reference -> loosened tolerance.
    assert jnp.allclose(out, ref, atol=6e-2, rtol=6e-2), float(jnp.max(jnp.abs(out - ref)))

    print("KERNEL_OK")
</pallas_src>

<mosaic_0001>
module attributes {stable_mosaic.version = 11 : i64} {
  func.func @kernel(%arg0: i32, %arg1: memref<2xi32, #tpu.memory_space<smem>>, %arg2: memref<1x8x32xf32, #tpu.memory_space<vmem>>, %arg3: memref<1x12x32xf32, #tpu.memory_space<vmem>>, %arg4: memref<1x10x32xf32, #tpu.memory_space<vmem>>, %arg5: memref<32x32xbf16, #tpu.memory_space<vmem>>, %arg6: memref<1x32xf32, #tpu.memory_space<vmem>>, %arg7: memref<32x32xbf16, #tpu.memory_space<vmem>>, %arg8: memref<1x32xf32, #tpu.memory_space<vmem>>, %arg9: memref<32x32xbf16, #tpu.memory_space<vmem>>, %arg10: memref<1x32xf32, #tpu.memory_space<vmem>>, %arg11: memref<32x32xbf16, #tpu.memory_space<vmem>>, %arg12: memref<1x32xf32, #tpu.memory_space<vmem>>, %arg13: memref<32x32xbf16, #tpu.memory_space<vmem>>, %arg14: memref<1x32xf32, #tpu.memory_space<vmem>>, %arg15: memref<32x32xbf16, #tpu.memory_space<vmem>>, %arg16: memref<1x32xf32, #tpu.memory_space<vmem>>, %arg17: memref<32x32xbf16, #tpu.memory_space<vmem>>, %arg18: memref<1x32xf32, #tpu.memory_space<vmem>>, %arg19: memref<32x32xbf16, #tpu.memory_space<vmem>>, %arg20: memref<1x32xf32, #tpu.memory_space<vmem>>, %arg21: memref<32x64xbf16, #tpu.memory_space<vmem>>, %arg22: memref<1x64xf32, #tpu.memory_space<vmem>>, %arg23: memref<64x32xbf16, #tpu.memory_space<vmem>>, %arg24: memref<1x32xf32, #tpu.memory_space<vmem>>, %arg25: memref<1x8x32xf32, #tpu.memory_space<vmem>>) attributes {dimension_semantics = [#tpu.dimension_semantics<parallel>], iteration_bounds = array<i64: 2>, scalar_prefetch = 1 : i64, scratch_operands = 0 : i64, tpu.core_type = #tpu.core_type<tc>, window_params = [{transform_indices = @transform_0, window_bounds = array<i64: 1, 8, 32>}, {transform_indices = @transform_1, window_bounds = array<i64: 1, 12, 32>}, {transform_indices = @transform_2, window_bounds = array<i64: 1, 10, 32>}, {pipeline_mode = #tpu.pipeline_mode<synchronous>, transform_indices = @transform_3, window_bounds = array<i64: 32, 32>}, {pipeline_mode = #tpu.pipeline_mode<synchronous>, transform_indices = @transform_4, window_bounds = array<i64: 1, 32>}, {pipeline_mode = #tpu.pipeline_mode<synchronous>, transform_indices = @transform_5, window_bounds = array<i64: 32, 32>}, {pipeline_mode = #tpu.pipeline_mode<synchronous>, transform_indices = @transform_6, window_bounds = array<i64: 1, 32>}, {pipeline_mode = #tpu.pipeline_mode<synchronous>, transform_indices = @transform_7, window_bounds = array<i64: 32, 32>}, {pipeline_mode = #tpu.pipeline_mode<synchronous>, transform_indices = @transform_8, window_bounds = array<i64: 1, 32>}, {pipeline_mode = #tpu.pipeline_mode<synchronous>, transform_indices = @transform_9, window_bounds = array<i64: 32, 32>}, {pipeline_mode = #tpu.pipeline_mode<synchronous>, transform_indices = @transform_10, window_bounds = array<i64: 1, 32>}, {pipeline_mode = #tpu.pipeline_mode<synchronous>, transform_indices = @transform_11, window_bounds = array<i64: 32, 32>}, {pipeline_mode = #tpu.pipeline_mode<synchronous>, transform_indices = @transform_12, window_bounds = array<i64: 1, 32>}, {pipeline_mode = #tpu.pipeline_mode<synchronous>, transform_indices = @transform_13, window_bounds = array<i64: 32, 32>}, {pipeline_mode = #tpu.pipeline_mode<synchronous>, transform_indices = @transform_14, window_bounds = array<i64: 1, 32>}, {pipeline_mode = #tpu.pipeline_mode<synchronous>, transform_indices = @transform_15, window_bounds = array<i64: 32, 32>}, {pipeline_mode = #tpu.pipeline_mode<synchronous>, transform_indices = @transform_16, window_bounds = array<i64: 1, 32>}, {pipeline_mode = #tpu.pipeline_mode<synchronous>, transform_indices = @transform_17, window_bounds = array<i64: 32, 32>}, {pipeline_mode = #tpu.pipeline_mode<synchronous>, transform_indices = @transform_18, window_bounds = array<i64: 1, 32>}, {pipeline_mode = #tpu.pipeline_mode<synchronous>, transform_indices = @transform_19, window_bounds = array<i64: 32, 64>}, {pipeline_mode = #tpu.pipeline_mode<synchronous>, transform_indices = @transform_20, window_bounds = array<i64: 1, 64>}, {pipeline_mode = #tpu.pipeline_mode<synchronous>, transform_indices = @transform_21, window_bounds = array<i64: 64, 32>}, {pipeline_mode = #tpu.pipeline_mode<synchronous>, transform_indices = @transform_22, window_bounds = array<i64: 1, 32>}, {transform_indices = @transform_23, window_bounds = array<i64: 1, 8, 32>}]} {
    %c0 = arith.constant 0 : index
    %c0_0 = arith.constant 0 : index
    %c0_1 = arith.constant 0 : index
    %0 = vector.load %arg2[%c0, %c0_0, %c0_1] : memref<1x8x32xf32, #tpu.memory_space<vmem>>, vector<1x8x32xf32>
    %1 = vector.shape_cast %0 : vector<1x8x32xf32> to vector<8x32xf32>
    %c0_2 = arith.constant 0 : index
    %c0_3 = arith.constant 0 : index
    %c0_4 = arith.constant 0 : index
    %2 = vector.load %arg3[%c0_2, %c0_3, %c0_4] : memref<1x12x32xf32, #tpu.memory_space<vmem>>, vector<1x12x32xf32>
    %3 = vector.shape_cast %2 : vector<1x12x32xf32> to vector<12x32xf32>
    %c0_5 = arith.constant 0 : index
    %c0_6 = arith.constant 0 : index
    %c0_7 = arith.constant 0 : index
    %4 = vector.load %arg4[%c0_5, %c0_6, %c0_7] : memref<1x10x32xf32, #tpu.memory_space<vmem>>, vector<1x10x32xf32>
    %5 = vector.shape_cast %4 : vector<1x10x32xf32> to vector<10x32xf32>
    %c0_8 = arith.constant 0 : index
    %c0_9 = arith.constant 0 : index
    %6 = vector.load %arg5[%c0_8, %c0_9] : memref<32x32xbf16, #tpu.memory_space<vmem>>, vector<32x32xbf16>
    %c0_10 = arith.constant 0 : index
    %c0_11 = arith.constant 0 : index
    %7 = vector.load %arg6[%c0_10, %c0_11] : memref<1x32xf32, #tpu.memory_space<vmem>>, vector<1x32xf32>
    %c0_12 = arith.constant 0 : index
    %c0_13 = arith.constant 0 : index
    %8 = vector.load %arg7[%c0_12, %c0_13] : memref<32x32xbf16, #tpu.memory_space<vmem>>, vector<32x32xbf16>
    %c0_14 = arith.constant 0 : index
    %c0_15 = arith.constant 0 : index
    %9 = vector.load %arg8[%c0_14, %c0_15] : memref<1x32xf32, #tpu.memory_space<vmem>>, vector<1x32xf32>
    %c0_16 = arith.constant 0 : index
    %c0_17 = arith.constant 0 : index
    %10 = vector.load %arg9[%c0_16, %c0_17] : memref<32x32xbf16, #tpu.memory_space<vmem>>, vector<32x32xbf16>
    %c0_18 = arith.constant 0 : index
    %c0_19 = arith.constant 0 : index
    %11 = vector.load %arg10[%c0_18, %c0_19] : memref<1x32xf32, #tpu.memory_space<vmem>>, vector<1x32xf32>
    %c0_20 = arith.constant 0 : index
    %c0_21 = arith.constant 0 : index
    %12 = vector.load %arg11[%c0_20, %c0_21] : memref<32x32xbf16, #tpu.memory_space<vmem>>, vector<32x32xbf16>
    %c0_22 = arith.constant 0 : index
    %c0_23 = arith.constant 0 : index
    %13 = vector.load %arg12[%c0_22, %c0_23] : memref<1x32xf32, #tpu.memory_space<vmem>>, vector<1x32xf32>
    %14 = arith.truncf %1 : vector<8x32xf32> to vector<8x32xbf16>
    %15 = arith.truncf %3 : vector<12x32xf32> to vector<12x32xbf16>
    %cst = arith.constant dense<0.000000e+00> : vector<8x32xf32>
    %16 = tpu.matmul %14, %6, %cst {dimension_numbers = #tpu.dot_dimension_numbers<[1], [0], [0], [1], [0, 0, 1, 1], [], []>} : vector<8x32xbf16>, vector<32x32xbf16>, vector<8x32xf32> -> vector<8x32xf32>
    %17 = vector.broadcast %7 : vector<1x32xf32> to vector<8x32xf32>
    %18 = arith.addf %16, %17 : vector<8x32xf32>
    %cst_24 = arith.constant dense<0.000000e+00> : vector<12x32xf32>
    %19 = tpu.matmul %15, %8, %cst_24 {dimension_numbers = #tpu.dot_dimension_numbers<[1], [0], [0], [1], [0, 0, 1, 1], [], []>} : vector<12x32xbf16>, vector<32x32xbf16>, vector<12x32xf32> -> vector<12x32xf32>
    %20 = vector.broadcast %9 : vector<1x32xf32> to vector<12x32xf32>
    %21 = arith.addf %19, %20 : vector<12x32xf32>
    %cst_25 = arith.constant dense<0.000000e+00> : vector<12x32xf32>
    %22 = tpu.matmul %15, %10, %cst_25 {dimension_numbers = #tpu.dot_dimension_numbers<[1], [0], [0], [1], [0, 0, 1, 1], [], []>} : vector<12x32xbf16>, vector<32x32xbf16>, vector<12x32xf32> -> vector<12x32xf32>
    %23 = vector.broadcast %11 : vector<1x32xf32> to vector<12x32xf32>
    %24 = arith.addf %22, %23 : vector<12x32xf32>
    %cst_26 = arith.constant 0.353553385 : f32
    %25 = vector.broadcast %cst_26 : f32 to vector<8x32xf32>
    %26 = arith.mulf %18, %25 : vector<8x32xf32>
    %27 = vector.extract_strided_slice %26 {offsets = [0, 0], sizes = [8, 8], strides = [1, 1]} : vector<8x32xf32> to vector<8x8xf32>
    %28 = arith.truncf %27 : vector<8x8xf32> to vector<8x8xbf16>
    %29 = vector.extract_strided_slice %21 {offsets = [0, 0], sizes = [12, 8], strides = [1, 1]} : vector<12x32xf32> to vector<12x8xf32>
    %30 = arith.truncf %29 : vector<12x8xf32> to vector<12x8xbf16>
    %31 = vector.extract_strided_slice %24 {offsets = [0, 0], sizes = [12, 8], strides = [1, 1]} : vector<12x32xf32> to vector<12x8xf32>
    %32 = arith.truncf %31 : vector<12x8xf32> to vector<12x8xbf16>
    %cst_27 = arith.constant dense<0.000000e+00> : vector<8x12xf32>
    %33 = tpu.matmul %28, %30, %cst_27 {dimension_numbers = #tpu.dot_dimension_numbers<[1], [1], [0], [0], [0, 0, 1, 0], [], []>} : vector<8x8xbf16>, vector<12x8xbf16>, vector<8x12xf32> -> vector<8x12xf32>
    %cst_28 = arith.constant dense<0xFF800000> : vector<8xf32>
    %34 = vector.multi_reduction <maximumf>, %33, %cst_28 [1] : vector<8x12xf32> to vector<8xf32>
    %35 = vector.shape_cast %34 : vector<8xf32> to vector<8x1xf32>
    %36 = vector.broadcast %35 : vector<8x1xf32> to vector<8x12xf32>
    %37 = arith.subf %33, %36 : vector<8x12xf32>
    %38 = math.exp %37 : vector<8x12xf32>
    %cst_29 = arith.constant dense<0.000000e+00> : vector<8xf32>
    %39 = vector.multi_reduction <add>, %38, %cst_29 [1] : vector<8x12xf32> to vector<8xf32>
    %40 = vector.shape_cast %39 : vector<8xf32> to vector<8x1xf32>
    %41 = tpu.reciprocal %40 {approx = true} : vector<8x1xf32> -> vector<8x1xf32>
    %42 = vector.broadcast %41 : vector<8x1xf32> to vector<8x12xf32>
    %43 = arith.mulf %38, %42 : vector<8x12xf32>
    %44 = arith.truncf %43 : vector<8x12xf32> to vector<8x12xbf16>
    %cst_30 = arith.constant dense<0.000000e+00> : vector<8x8xf32>
    %45 = tpu.matmul %44, %32, %cst_30 {dimension_numbers = #tpu.dot_dimension_numbers<[1], [0], [0], [1], [0, 0, 1, 1], [], []>} : vector<8x12xbf16>, vector<12x8xbf16>, vector<8x8xf32> -> vector<8x8xf32>
    %46 = vector.extract_strided_slice %26 {offsets = [0, 8], sizes = [8, 8], strides = [1, 1]} : vector<8x32xf32> to vector<8x8xf32>
    %47 = arith.truncf %46 : vector<8x8xf32> to vector<8x8xbf16>
    %48 = vector.extract_strided_slice %21 {offsets = [0, 8], sizes = [12, 8], strides = [1, 1]} : vector<12x32xf32> to vector<12x8xf32>
    %49 = arith.truncf %48 : vector<12x8xf32> to vector<12x8xbf16>
    %50 = vector.extract_strided_slice %24 {offsets = [0, 8], sizes = [12, 8], strides = [1, 1]} : vector<12x32xf32> to vector<12x8xf32>
    %51 = arith.truncf %50 : vector<12x8xf32> to vector<12x8xbf16>
    %cst_31 = arith.constant dense<0.000000e+00> : vector<8x12xf32>
    %52 = tpu.matmul %47, %49, %cst_31 {dimension_numbers = #tpu.dot_dimension_numbers<[1], [1], [0], [0], [0, 0, 1, 0], [], []>} : vector<8x8xbf16>, vector<12x8xbf16>, vector<8x12xf32> -> vector<8x12xf32>
    %cst_32 = arith.constant dense<0xFF800000> : vector<8xf32>
    %53 = vector.multi_reduction <maximumf>, %52, %cst_32 [1] : vector<8x12xf32> to vector<8xf32>
    %54 = vector.shape_cast %53 : vector<8xf32> to vector<8x1xf32>
    %55 = vector.broadcast %54 : vector<8x1xf32> to vector<8x12xf32>
    %56 = arith.subf %52, %55 : vector<8x12xf32>
    %57 = math.exp %56 : vector<8x12xf32>
    %cst_33 = arith.constant dense<0.000000e+00> : vector<8xf32>
    %58 = vector.multi_reduction <add>, %57, %cst_33 [1] : vector<8x12xf32> to vector<8xf32>
    %59 = vector.shape_cast %58 : vector<8xf32> to vector<8x1xf32>
    %60 = tpu.reciprocal %59 {approx = true} : vector<8x1xf32> -> vector<8x1xf32>
    %61 = vector.broadcast %60 : vector<8x1xf32> to vector<8x12xf32>
    %62 = arith.mulf %57, %61 : vector<8x12xf32>
    %63 = arith.truncf %62 : vector<8x12xf32> to vector<8x12xbf16>
    %cst_34 = arith.constant dense<0.000000e+00> : vector<8x8xf32>
    %64 = tpu.matmul %63, %51, %cst_34 {dimension_numbers = #tpu.dot_dimension_numbers<[1], [0], [0], [1], [0, 0, 1, 1], [], []>} : vector<8x12xbf16>, vector<12x8xbf16>, vector<8x8xf32> -> vector<8x8xf32>
    %65 = vector.extract_strided_slice %26 {offsets = [0, 16], sizes = [8, 8], strides = [1, 1]} : vector<8x32xf32> to vector<8x8xf32>
    %66 = arith.truncf %65 : vector<8x8xf32> to vector<8x8xbf16>
    %67 = vector.extract_strided_slice %21 {offsets = [0, 16], sizes = [12, 8], strides = [1, 1]} : vector<12x32xf32> to vector<12x8xf32>
    %68 = arith.truncf %67 : vector<12x8xf32> to vector<12x8xbf16>
    %69 = vector.extract_strided_slice %24 {offsets = [0, 16], sizes = [12, 8], strides = [1, 1]} : vector<12x32xf32> to vector<12x8xf32>
    %70 = arith.truncf %69 : vector<12x8xf32> to vector<12x8xbf16>
    %cst_35 = arith.constant dense<0.000000e+00> : vector<8x12xf32>
    %71 = tpu.matmul %66, %68, %cst_35 {dimension_numbers = #tpu.dot_dimension_numbers<[1], [1], [0], [0], [0, 0, 1, 0], [], []>} : vector<8x8xbf16>, vector<12x8xbf16>, vector<8x12xf32> -> vector<8x12xf32>
    %cst_36 = arith.constant dense<0xFF800000> : vector<8xf32>
    %72 = vector.multi_reduction <maximumf>, %71, %cst_36 [1] : vector<8x12xf32> to vector<8xf32>
    %73 = vector.shape_cast %72 : vector<8xf32> to vector<8x1xf32>
    %74 = vector.broadcast %73 : vector<8x1xf32> to vector<8x12xf32>
    %75 = arith.subf %71, %74 : vector<8x12xf32>
    %76 = math.exp %75 : vector<8x12xf32>
    %cst_37 = arith.constant dense<0.000000e+00> : vector<8xf32>
    %77 = vector.multi_reduction <add>, %76, %cst_37 [1] : vector<8x12xf32> to vector<8xf32>
    %78 = vector.shape_cast %77 : vector<8xf32> to vector<8x1xf32>
    %79 = tpu.reciprocal %78 {approx = true} : vector<8x1xf32> -> vector<8x1xf32>
    %80 = vector.broadcast %79 : vector<8x1xf32> to vector<8x12xf32>
    %81 = arith.mulf %76, %80 : vector<8x12xf32>
    %82 = arith.truncf %81 : vector<8x12xf32> to vector<8x12xbf16>
    %cst_38 = arith.constant dense<0.000000e+00> : vector<8x8xf32>
    %83 = tpu.matmul %82, %70, %cst_38 {dimension_numbers = #tpu.dot_dimension_numbers<[1], [0], [0], [1], [0, 0, 1, 1], [], []>} : vector<8x12xbf16>, vector<12x8xbf16>, vector<8x8xf32> -> vector<8x8xf32>
    %84 = vector.extract_strided_slice %26 {offsets = [0, 24], sizes = [8, 8], strides = [1, 1]} : vector<8x32xf32> to vector<8x8xf32>
    %85 = arith.truncf %84 : vector<8x8xf32> to vector<8x8xbf16>
    %86 = vector.extract_strided_slice %21 {offsets = [0, 24], sizes = [12, 8], strides = [1, 1]} : vector<12x32xf32> to vector<12x8xf32>
    %87 = arith.truncf %86 : vector<12x8xf32> to vector<12x8xbf16>
    %88 = vector.extract_strided_slice %24 {offsets = [0, 24], sizes = [12, 8], strides = [1, 1]} : vector<12x32xf32> to vector<12x8xf32>
    %89 = arith.truncf %88 : vector<12x8xf32> to vector<12x8xbf16>
    %cst_39 = arith.constant dense<0.000000e+00> : vector<8x12xf32>
    %90 = tpu.matmul %85, %87, %cst_39 {dimension_numbers = #tpu.dot_dimension_numbers<[1], [1], [0], [0], [0, 0, 1, 0], [], []>} : vector<8x8xbf16>, vector<12x8xbf16>, vector<8x12xf32> -> vector<8x12xf32>
    %cst_40 = arith.constant dense<0xFF800000> : vector<8xf32>
    %91 = vector.multi_reduction <maximumf>, %90, %cst_40 [1] : vector<8x12xf32> to vector<8xf32>
    %92 = vector.shape_cast %91 : vector<8xf32> to vector<8x1xf32>
    %93 = vector.broadcast %92 : vector<8x1xf32> to vector<8x12xf32>
    %94 = arith.subf %90, %93 : vector<8x12xf32>
    %95 = math.exp %94 : vector<8x12xf32>
    %cst_41 = arith.constant dense<0.000000e+00> : vector<8xf32>
    %96 = vector.multi_reduction <add>, %95, %cst_41 [1] : vector<8x12xf32> to vector<8xf32>
    %97 = vector.shape_cast %96 : vector<8xf32> to vector<8x1xf32>
    %98 = tpu.reciprocal %97 {approx = true} : vector<8x1xf32> -> vector<8x1xf32>
    %99 = vector.broadcast %98 : vector<8x1xf32> to vector<8x12xf32>
    %100 = arith.mulf %95, %99 : vector<8x12xf32>
    %101 = arith.truncf %100 : vector<8x12xf32> to vector<8x12xbf16>
    %cst_42 = arith.constant dense<0.000000e+00> : vector<8x8xf32>
    %102 = tpu.matmul %101, %89, %cst_42 {dimension_numbers = #tpu.dot_dimension_numbers<[1], [0], [0], [1], [0, 0, 1, 1], [], []>} : vector<8x12xbf16>, vector<12x8xbf16>, vector<8x8xf32> -> vector<8x8xf32>
    %103 = tpu.concatenate %45, %64, %83, %102 in 1 : vector<8x8xf32>, vector<8x8xf32>, vector<8x8xf32>, vector<8x8xf32> -> vector<8x32xf32>
    %104 = arith.truncf %103 : vector<8x32xf32> to vector<8x32xbf16>
    %cst_43 = arith.constant dense<0.000000e+00> : vector<8x32xf32>
    %105 = tpu.matmul %104, %12, %cst_43 {dimension_numbers = #tpu.dot_dimension_numbers<[1], [0], [0], [1], [0, 0, 1, 1], [], []>} : vector<8x32xbf16>, vector<32x32xbf16>, vector<8x32xf32> -> vector<8x32xf32>
    %106 = vector.broadcast %13 : vector<1x32xf32> to vector<8x32xf32>
    %107 = arith.addf %105, %106 : vector<8x32xf32>
    %108 = arith.addf %1, %107 : vector<8x32xf32>
    %109 = vector.shape_cast %108 : vector<8x32xf32> to vector<1x8x32xf32>
    %cst_44 = arith.constant dense<0.000000e+00> : vector<1xf32>
    %110 = vector.multi_reduction <add>, %109, %cst_44 [1, 2] : vector<1x8x32xf32> to vector<1xf32>
    %111 = vector.shape_cast %110 : vector<1xf32> to vector<1x1x1xf32>
    %112 = vector.extract %111[0, 0, 0] : f32 from vector<1x1x1xf32>
    %cst_45 = arith.constant 2.560000e+02 : f32
    %113 = arith.divf %112, %cst_45 : f32
    %114 = vector.broadcast %113 : f32 to vector<8x32xf32>
    %115 = arith.subf %108, %114 : vector<8x32xf32>
    %116 = arith.mulf %115, %115 : vector<8x32xf32>
    %117 = vector.shape_cast %116 : vector<8x32xf32> to vector<1x8x32xf32>
    %cst_46 = arith.constant dense<0.000000e+00> : vector<1xf32>
    %118 = vector.multi_reduction <add>, %117, %cst_46 [1, 2] : vector<1x8x32xf32> to vector<1xf32>
    %119 = vector.shape_cast %118 : vector<1xf32> to vector<1x1x1xf32>
    %120 = vector.extract %119[0, 0, 0] : f32 from vector<1x1x1xf32>
    %cst_47 = arith.constant 2.560000e+02 : f32
    %121 = arith.divf %120, %cst_47 : f32
    %122 = vector.broadcast %113 : f32 to vector<8x32xf32>
    %123 = arith.subf %108, %122 : vector<8x32xf32>
    %cst_48 = arith.constant 9.99999974E-6 : f32
    %124 = arith.addf %121, %cst_48 : f32
    %125 = math.rsqrt %124 : f32
    %126 = vector.broadcast %125 : f32 to vector<8x32xf32>
    %127 = arith.mulf %123, %126 : vector<8x32xf32>
    %128 = arith.index_cast %arg0 : i32 to index
    %129 = memref.load %arg1[%128] : memref<2xi32, #tpu.memory_space<smem>>
    %130 = tpu.iota {dimensions = array<i32: 1>} : vector<8x10xi32>
    %131 = vector.broadcast %129 : i32 to vector<8x10xi32>
    %132 = arith.cmpi slt, %130, %131 : vector<8x10xi32>
    %cst_49 = arith.constant 0.000000e+00 : f32
    %cst_50 = arith.constant -1.000000e+06 : f32
    %133 = vector.broadcast %cst_49 : f32 to vector<8x10xf32>
    %134 = vector.broadcast %cst_50 : f32 to vector<8x10xf32>
    %135 = arith.select %132, %133, %134 : vector<8x10xi1>, vector<8x10xf32>
    %c0_51 = arith.constant 0 : index
    %c0_52 = arith.constant 0 : index
    %136 = vector.load %arg13[%c0_51, %c0_52] : memref<32x32xbf16, #tpu.memory_space<vmem>>, vector<32x32xbf16>
    %c0_53 = arith.constant 0 : index
    %c0_54 = arith.constant 0 : index
    %137 = vector.load %arg14[%c0_53, %c0_54] : memref<1x32xf32, #tpu.memory_space<vmem>>, vector<1x32xf32>
    %c0_55 = arith.constant 0 : index
    %c0_56 = arith.constant 0 : index
    %138 = vector.load %arg15[%c0_55, %c0_56] : memref<32x32xbf16, #tpu.memory_space<vmem>>, vector<32x32xbf16>
    %c0_57 = arith.constant 0 : index
    %c0_58 = arith.constant 0 : index
    %139 = vector.load %arg16[%c0_57, %c0_58] : memref<1x32xf32, #tpu.memory_space<vmem>>, vector<1x32xf32>
    %c0_59 = arith.constant 0 : index
    %c0_60 = arith.constant 0 : index
    %140 = vector.load %arg17[%c0_59, %c0_60] : memref<32x32xbf16, #tpu.memory_space<vmem>>, vector<32x32xbf16>
    %c0_61 = arith.constant 0 : index
    %c0_62 = arith.constant 0 : index
    %141 = vector.load %arg18[%c0_61, %c0_62] : memref<1x32xf32, #tpu.memory_space<vmem>>, vector<1x32xf32>
    %c0_63 = arith.constant 0 : index
    %c0_64 = arith.constant 0 : index
    %142 = vector.load %arg19[%c0_63, %c0_64] : memref<32x32xbf16, #tpu.memory_space<vmem>>, vector<32x32xbf16>
    %c0_65 = arith.constant 0 : index
    %c0_66 = arith.constant 0 : index
    %143 = vector.load %arg20[%c0_65, %c0_66] : memref<1x32xf32, #tpu.memory_space<vmem>>, vector<1x32xf32>
    %144 = arith.truncf %127 : vector<8x32xf32> to vector<8x32xbf16>
    %145 = arith.truncf %5 : vector<10x32xf32> to vector<10x32xbf16>
    %cst_67 = arith.constant dense<0.000000e+00> : vector<8x32xf32>
    %146 = tpu.matmul %144, %136, %cst_67 {dimension_numbers = #tpu.dot_dimension_numbers<[1], [0], [0], [1], [0, 0, 1, 1], [], []>} : vector<8x32xbf16>, vector<32x32xbf16>, vector<8x32xf32> -> vector<8x32xf32>
    %147 = vector.broadcast %137 : vector<1x32xf32> to vector<8x32xf32>
    %148 = arith.addf %146, %147 : vector<8x32xf32>
    %cst_68 = arith.constant dense<0.000000e+00> : vector<10x32xf32>
    %149 = tpu.matmul %145, %138, %cst_68 {dimension_numbers = #tpu.dot_dimension_numbers<[1], [0], [0], [1], [0, 0, 1, 1], [], []>} : vector<10x32xbf16>, vector<32x32xbf16>, vector<10x32xf32> -> vector<10x32xf32>
    %150 = vector.broadcast %139 : vector<1x32xf32> to vector<10x32xf32>
    %151 = arith.addf %149, %150 : vector<10x32xf32>
    %cst_69 = arith.constant dense<0.000000e+00> : vector<10x32xf32>
    %152 = tpu.matmul %145, %140, %cst_69 {dimension_numbers = #tpu.dot_dimension_numbers<[1], [0], [0], [1], [0, 0, 1, 1], [], []>} : vector<10x32xbf16>, vector<32x32xbf16>, vector<10x32xf32> -> vector<10x32xf32>
    %153 = vector.broadcast %141 : vector<1x32xf32> to vector<10x32xf32>
    %154 = arith.addf %152, %153 : vector<10x32xf32>
    %cst_70 = arith.constant 0.353553385 : f32
    %155 = vector.broadcast %cst_70 : f32 to vector<8x32xf32>
    %156 = arith.mulf %148, %155 : vector<8x32xf32>
    %157 = vector.extract_strided_slice %156 {offsets = [0, 0], sizes = [8, 8], strides = [1, 1]} : vector<8x32xf32> to vector<8x8xf32>
    %158 = arith.truncf %157 : vector<8x8xf32> to vector<8x8xbf16>
    %159 = vector.extract_strided_slice %151 {offsets = [0, 0], sizes = [10, 8], strides = [1, 1]} : vector<10x32xf32> to vector<10x8xf32>
    %160 = arith.truncf %159 : vector<10x8xf32> to vector<10x8xbf16>
    %161 = vector.extract_strided_slice %154 {offsets = [0, 0], sizes = [10, 8], strides = [1, 1]} : vector<10x32xf32> to vector<10x8xf32>
    %162 = arith.truncf %161 : vector<10x8xf32> to vector<10x8xbf16>
    %cst_71 = arith.constant dense<0.000000e+00> : vector<8x10xf32>
    %163 = tpu.matmul %158, %160, %cst_71 {dimension_numbers = #tpu.dot_dimension_numbers<[1], [1], [0], [0], [0, 0, 1, 0], [], []>} : vector<8x8xbf16>, vector<10x8xbf16>, vector<8x10xf32> -> vector<8x10xf32>
    %164 = arith.addf %163, %135 : vector<8x10xf32>
    %cst_72 = arith.constant dense<0xFF800000> : vector<8xf32>
    %165 = vector.multi_reduction <maximumf>, %164, %cst_72 [1] : vector<8x10xf32> to vector<8xf32>
    %166 = vector.shape_cast %165 : vector<8xf32> to vector<8x1xf32>
    %167 = vector.broadcast %166 : vector<8x1xf32> to vector<8x10xf32>
    %168 = arith.subf %164, %167 : vector<8x10xf32>
    %169 = math.exp %168 : vector<8x10xf32>
    %cst_73 = arith.constant dense<0.000000e+00> : vector<8xf32>
    %170 = vector.multi_reduction <add>, %169, %cst_73 [1] : vector<8x10xf32> to vector<8xf32>
    %171 = vector.shape_cast %170 : vector<8xf32> to vector<8x1xf32>
    %172 = tpu.reciprocal %171 {approx = true} : vector<8x1xf32> -> vector<8x1xf32>
    %173 = vector.broadcast %172 : vector<8x1xf32> to vector<8x10xf32>
    %174 = arith.mulf %169, %173 : vector<8x10xf32>
    %175 = arith.truncf %174 : vector<8x10xf32> to vector<8x10xbf16>
    %cst_74 = arith.constant dense<0.000000e+00> : vector<8x8xf32>
    %176 = tpu.matmul %175, %162, %cst_74 {dimension_numbers = #tpu.dot_dimension_numbers<[1], [0], [0], [1], [0, 0, 1, 1], [], []>} : vector<8x10xbf16>, vector<10x8xbf16>, vector<8x8xf32> -> vector<8x8xf32>
    %177 = vector.extract_strided_slice %156 {offsets = [0, 8], sizes = [8, 8], strides = [1, 1]} : vector<8x32xf32> to vector<8x8xf32>
    %178 = arith.truncf %177 : vector<8x8xf32> to vector<8x8xbf16>
    %179 = vector.extract_strided_slice %151 {offsets = [0, 8], sizes = [10, 8], strides = [1, 1]} : vector<10x32xf32> to vector<10x8xf32>
    %180 = arith.truncf %179 : vector<10x8xf32> to vector<10x8xbf16>
    %181 = vector.extract_strided_slice %154 {offsets = [0, 8], sizes = [10, 8], strides = [1, 1]} : vector<10x32xf32> to vector<10x8xf32>
    %182 = arith.truncf %181 : vector<10x8xf32> to vector<10x8xbf16>
    %cst_75 = arith.constant dense<0.000000e+00> : vector<8x10xf32>
    %183 = tpu.matmul %178, %180, %cst_75 {dimension_numbers = #tpu.dot_dimension_numbers<[1], [1], [0], [0], [0, 0, 1, 0], [], []>} : vector<8x8xbf16>, vector<10x8xbf16>, vector<8x10xf32> -> vector<8x10xf32>
    %184 = arith.addf %183, %135 : vector<8x10xf32>
    %cst_76 = arith.constant dense<0xFF800000> : vector<8xf32>
    %185 = vector.multi_reduction <maximumf>, %184, %cst_76 [1] : vector<8x10xf32> to vector<8xf32>
    %186 = vector.shape_cast %185 : vector<8xf32> to vector<8x1xf32>
    %187 = vector.broadcast %186 : vector<8x1xf32> to vector<8x10xf32>
    %188 = arith.subf %184, %187 : vector<8x10xf32>
    %189 = math.exp %188 : vector<8x10xf32>
    %cst_77 = arith.constant dense<0.000000e+00> : vector<8xf32>
    %190 = vector.multi_reduction <add>, %189, %cst_77 [1] : vector<8x10xf32> to vector<8xf32>
    %191 = vector.shape_cast %190 : vector<8xf32> to vector<8x1xf32>
    %192 = tpu.reciprocal %191 {approx = true} : vector<8x1xf32> -> vector<8x1xf32>
    %193 = vector.broadcast %192 : vector<8x1xf32> to vector<8x10xf32>
    %194 = arith.mulf %189, %193 : vector<8x10xf32>
    %195 = arith.truncf %194 : vector<8x10xf32> to vector<8x10xbf16>
    %cst_78 = arith.constant dense<0.000000e+00> : vector<8x8xf32>
    %196 = tpu.matmul %195, %182, %cst_78 {dimension_numbers = #tpu.dot_dimension_numbers<[1], [0], [0], [1], [0, 0, 1, 1], [], []>} : vector<8x10xbf16>, vector<10x8xbf16>, vector<8x8xf32> -> vector<8x8xf32>
    %197 = vector.extract_strided_slice %156 {offsets = [0, 16], sizes = [8, 8], strides = [1, 1]} : vector<8x32xf32> to vector<8x8xf32>
    %198 = arith.truncf %197 : vector<8x8xf32> to vector<8x8xbf16>
    %199 = vector.extract_strided_slice %151 {offsets = [0, 16], sizes = [10, 8], strides = [1, 1]} : vector<10x32xf32> to vector<10x8xf32>
    %200 = arith.truncf %199 : vector<10x8xf32> to vector<10x8xbf16>
    %201 = vector.extract_strided_slice %154 {offsets = [0, 16], sizes = [10, 8], strides = [1, 1]} : vector<10x32xf32> to vector<10x8xf32>
    %202 = arith.truncf %201 : vector<10x8xf32> to vector<10x8xbf16>
    %cst_79 = arith.constant dense<0.000000e+00> : vector<8x10xf32>
    %203 = tpu.matmul %198, %200, %cst_79 {dimension_numbers = #tpu.dot_dimension_numbers<[1], [1], [0], [0], [0, 0, 1, 0], [], []>} : vector<8x8xbf16>, vector<10x8xbf16>, vector<8x10xf32> -> vector<8x10xf32>
    %204 = arith.addf %203, %135 : vector<8x10xf32>
    %cst_80 = arith.constant dense<0xFF800000> : vector<8xf32>
    %205 = vector.multi_reduction <maximumf>, %204, %cst_80 [1] : vector<8x10xf32> to vector<8xf32>
    %206 = vector.shape_cast %205 : vector<8xf32> to vector<8x1xf32>
    %207 = vector.broadcast %206 : vector<8x1xf32> to vector<8x10xf32>
    %208 = arith.subf %204, %207 : vector<8x10xf32>
    %209 = math.exp %208 : vector<8x10xf32>
    %cst_81 = arith.constant dense<0.000000e+00> : vector<8xf32>
    %210 = vector.multi_reduction <add>, %209, %cst_81 [1] : vector<8x10xf32> to vector<8xf32>
    %211 = vector.shape_cast %210 : vector<8xf32> to vector<8x1xf32>
    %212 = tpu.reciprocal %211 {approx = true} : vector<8x1xf32> -> vector<8x1xf32>
    %213 = vector.broadcast %212 : vector<8x1xf32> to vector<8x10xf32>
    %214 = arith.mulf %209, %213 : vector<8x10xf32>
    %215 = arith.truncf %214 : vector<8x10xf32> to vector<8x10xbf16>
    %cst_82 = arith.constant dense<0.000000e+00> : vector<8x8xf32>
    %216 = tpu.matmul %215, %202, %cst_82 {dimension_numbers = #tpu.dot_dimension_numbers<[1], [0], [0], [1], [0, 0, 1, 1], [], []>} : vector<8x10xbf16>, vector<10x8xbf16>, vector<8x8xf32> -> vector<8x8xf32>
    %217 = vector.extract_strided_slice %156 {offsets = [0, 24], sizes = [8, 8], strides = [1, 1]} : vector<8x32xf32> to vector<8x8xf32>
    %218 = arith.truncf %217 : vector<8x8xf32> to vector<8x8xbf16>
    %219 = vector.extract_strided_slice %151 {offsets = [0, 24], sizes = [10, 8], strides = [1, 1]} : vector<10x32xf32> to vector<10x8xf32>
    %220 = arith.truncf %219 : vector<10x8xf32> to vector<10x8xbf16>
    %221 = vector.extract_strided_slice %154 {offsets = [0, 24], sizes = [10, 8], strides = [1, 1]} : vector<10x32xf32> to vector<10x8xf32>
    %222 = arith.truncf %221 : vector<10x8xf32> to vector<10x8xbf16>
    %cst_83 = arith.constant dense<0.000000e+00> : vector<8x10xf32>
    %223 = tpu.matmul %218, %220, %cst_83 {dimension_numbers = #tpu.dot_dimension_numbers<[1], [1], [0], [0], [0, 0, 1, 0], [], []>} : vector<8x8xbf16>, vector<10x8xbf16>, vector<8x10xf32> -> vector<8x10xf32>
    %224 = arith.addf %223, %135 : vector<8x10xf32>
    %cst_84 = arith.constant dense<0xFF800000> : vector<8xf32>
    %225 = vector.multi_reduction <maximumf>, %224, %cst_84 [1] : vector<8x10xf32> to vector<8xf32>
    %226 = vector.shape_cast %225 : vector<8xf32> to vector<8x1xf32>
    %227 = vector.broadcast %226 : vector<8x1xf32> to vector<8x10xf32>
    %228 = arith.subf %224, %227 : vector<8x10xf32>
    %229 = math.exp %228 : vector<8x10xf32>
    %cst_85 = arith.constant dense<0.000000e+00> : vector<8xf32>
    %230 = vector.multi_reduction <add>, %229, %cst_85 [1] : vector<8x10xf32> to vector<8xf32>
    %231 = vector.shape_cast %230 : vector<8xf32> to vector<8x1xf32>
    %232 = tpu.reciprocal %231 {approx = true} : vector<8x1xf32> -> vector<8x1xf32>
    %233 = vector.broadcast %232 : vector<8x1xf32> to vector<8x10xf32>
    %234 = arith.mulf %229, %233 : vector<8x10xf32>
    %235 = arith.truncf %234 : vector<8x10xf32> to vector<8x10xbf16>
    %cst_86 = arith.constant dense<0.000000e+00> : vector<8x8xf32>
    %236 = tpu.matmul %235, %222, %cst_86 {dimension_numbers = #tpu.dot_dimension_numbers<[1], [0], [0], [1], [0, 0, 1, 1], [], []>} : vector<8x10xbf16>, vector<10x8xbf16>, vector<8x8xf32> -> vector<8x8xf32>
    %237 = tpu.concatenate %176, %196, %216, %236 in 1 : vector<8x8xf32>, vector<8x8xf32>, vector<8x8xf32>, vector<8x8xf32> -> vector<8x32xf32>
    %238 = arith.truncf %237 : vector<8x32xf32> to vector<8x32xbf16>
    %cst_87 = arith.constant dense<0.000000e+00> : vector<8x32xf32>
    %239 = tpu.matmul %238, %142, %cst_87 {dimension_numbers = #tpu.dot_dimension_numbers<[1], [0], [0], [1], [0, 0, 1, 1], [], []>} : vector<8x32xbf16>, vector<32x32xbf16>, vector<8x32xf32> -> vector<8x32xf32>
    %240 = vector.broadcast %143 : vector<1x32xf32> to vector<8x32xf32>
    %241 = arith.addf %239, %240 : vector<8x32xf32>
    %242 = arith.addf %127, %241 : vector<8x32xf32>
    %243 = vector.shape_cast %242 : vector<8x32xf32> to vector<1x8x32xf32>
    %cst_88 = arith.constant dense<0.000000e+00> : vector<1xf32>
    %244 = vector.multi_reduction <add>, %243, %cst_88 [1, 2] : vector<1x8x32xf32> to vector<1xf32>
    %245 = vector.shape_cast %244 : vector<1xf32> to vector<1x1x1xf32>
    %246 = vector.extract %245[0, 0, 0] : f32 from vector<1x1x1xf32>
    %cst_89 = arith.constant 2.560000e+02 : f32
    %247 = arith.divf %246, %cst_89 : f32
    %248 = vector.broadcast %247 : f32 to vector<8x32xf32>
    %249 = arith.subf %242, %248 : vector<8x32xf32>
    %250 = arith.mulf %249, %249 : vector<8x32xf32>
    %251 = vector.shape_cast %250 : vector<8x32xf32> to vector<1x8x32xf32>
    %cst_90 = arith.constant dense<0.000000e+00> : vector<1xf32>
    %252 = vector.multi_reduction <add>, %251, %cst_90 [1, 2] : vector<1x8x32xf32> to vector<1xf32>
    %253 = vector.shape_cast %252 : vector<1xf32> to vector<1x1x1xf32>
    %254 = vector.extract %253[0, 0, 0] : f32 from vector<1x1x1xf32>
    %cst_91 = arith.constant 2.560000e+02 : f32
    %255 = arith.divf %254, %cst_91 : f32
    %256 = vector.broadcast %247 : f32 to vector<8x32xf32>
    %257 = arith.subf %242, %256 : vector<8x32xf32>
    %cst_92 = arith.constant 9.99999974E-6 : f32
    %258 = arith.addf %255, %cst_92 : f32
    %259 = math.rsqrt %258 : f32
    %260 = vector.broadcast %259 : f32 to vector<8x32xf32>
    %261 = arith.mulf %257, %260 : vector<8x32xf32>
    %262 = arith.truncf %261 : vector<8x32xf32> to vector<8x32xbf16>
    %c0_93 = arith.constant 0 : index
    %c0_94 = arith.constant 0 : index
    %263 = vector.load %arg21[%c0_93, %c0_94] : memref<32x64xbf16, #tpu.memory_space<vmem>>, vector<32x64xbf16>
    %cst_95 = arith.constant dense<0.000000e+00> : vector<8x64xf32>
    %264 = tpu.matmul %262, %263, %cst_95 {dimension_numbers = #tpu.dot_dimension_numbers<[1], [0], [0], [1], [0, 0, 1, 1], [], []>} : vector<8x32xbf16>, vector<32x64xbf16>, vector<8x64xf32> -> vector<8x64xf32>
    %c0_96 = arith.constant 0 : index
    %c0_97 = arith.constant 0 : index
    %265 = vector.load %arg22[%c0_96, %c0_97] : memref<1x64xf32, #tpu.memory_space<vmem>>, vector<1x64xf32>
    %266 = vector.broadcast %265 : vector<1x64xf32> to vector<8x64xf32>
    %267 = arith.addf %264, %266 : vector<8x64xf32>
    %cst_98 = arith.constant 0.000000e+00 : f32
    %268 = vector.broadcast %cst_98 : f32 to vector<8x64xf32>
    %269 = arith.maximumf %267, %268 : vector<8x64xf32>
    %270 = arith.truncf %269 : vector<8x64xf32> to vector<8x64xbf16>
    %c0_99 = arith.constant 0 : index
    %c0_100 = arith.constant 0 : index
    %271 = vector.load %arg23[%c0_99, %c0_100] : memref<64x32xbf16, #tpu.memory_space<vmem>>, vector<64x32xbf16>
    %cst_101 = arith.constant dense<0.000000e+00> : vector<8x32xf32>
    %272 = tpu.matmul %270, %271, %cst_101 {dimension_numbers = #tpu.dot_dimension_numbers<[1], [0], [0], [1], [0, 0, 1, 1], [], []>} : vector<8x64xbf16>, vector<64x32xbf16>, vector<8x32xf32> -> vector<8x32xf32>
    %c0_102 = arith.constant 0 : index
    %c0_103 = arith.constant 0 : index
    %273 = vector.load %arg24[%c0_102, %c0_103] : memref<1x32xf32, #tpu.memory_space<vmem>>, vector<1x32xf32>
    %274 = vector.broadcast %273 : vector<1x32xf32> to vector<8x32xf32>
    %275 = arith.addf %272, %274 : vector<8x32xf32>
    %276 = arith.addf %261, %275 : vector<8x32xf32>
    %277 = vector.shape_cast %276 : vector<8x32xf32> to vector<1x8x32xf32>
    %cst_104 = arith.constant dense<0.000000e+00> : vector<1xf32>
    %278 = vector.multi_reduction <add>, %277, %cst_104 [1, 2] : vector<1x8x32xf32> to vector<1xf32>
    %279 = vector.shape_cast %278 : vector<1xf32> to vector<1x1x1xf32>
    %280 = vector.extract %279[0, 0, 0] : f32 from vector<1x1x1xf32>
    %cst_105 = arith.constant 2.560000e+02 : f32
    %281 = arith.divf %280, %cst_105 : f32
    %282 = vector.broadcast %281 : f32 to vector<8x32xf32>
    %283 = arith.subf %276, %282 : vector<8x32xf32>
    %284 = arith.mulf %283, %283 : vector<8x32xf32>
    %285 = vector.shape_cast %284 : vector<8x32xf32> to vector<1x8x32xf32>
    %cst_106 = arith.constant dense<0.000000e+00> : vector<1xf32>
    %286 = vector.multi_reduction <add>, %285, %cst_106 [1, 2] : vector<1x8x32xf32> to vector<1xf32>
    %287 = vector.shape_cast %286 : vector<1xf32> to vector<1x1x1xf32>
    %288 = vector.extract %287[0, 0, 0] : f32 from vector<1x1x1xf32>
    %cst_107 = arith.constant 2.560000e+02 : f32
    %289 = arith.divf %288, %cst_107 : f32
    %290 = vector.broadcast %281 : f32 to vector<8x32xf32>
    %291 = arith.subf %276, %290 : vector<8x32xf32>
    %cst_108 = arith.constant 9.99999974E-6 : f32
    %292 = arith.addf %289, %cst_108 : f32
    %293 = math.rsqrt %292 : f32
    %294 = vector.broadcast %293 : f32 to vector<8x32xf32>
    %295 = arith.mulf %291, %294 : vector<8x32xf32>
    %c0_109 = arith.constant 0 : index
    %c0_110 = arith.constant 0 : index
    %c0_111 = arith.constant 0 : index
    %296 = vector.load %arg25[%c0_109, %c0_110, %c0_111] : memref<1x8x32xf32, #tpu.memory_space<vmem>>, vector<1x8x32xf32>
    %297 = vector.shape_cast %296 : vector<1x8x32xf32> to vector<8x32xf32>
    %298 = vector.shape_cast %295 : vector<8x32xf32> to vector<1x8x32xf32>
    tpu.vector_store %arg25[%c0_109, %c0_110, %c0_111], %298 {strides = array<i32>} : memref<1x8x32xf32, #tpu.memory_space<vmem>>, vector<1x8x32xf32>,
    return
  }
  func.func @transform_0(%arg0: i32, %arg1: memref<2xi32, #tpu.memory_space<smem>>) -> (i32, i32, i32) {
    %c0_i32 = arith.constant 0 : i32
    %c0_i32_0 = arith.constant 0 : i32
    %c0_i32_1 = arith.constant 0 : i32
    return %arg0, %c0_i32, %c0_i32_0 : i32, i32, i32
  }
  func.func @transform_1(%arg0: i32, %arg1: memref<2xi32, #tpu.memory_space<smem>>) -> (i32, i32, i32) {
    %c0_i32 = arith.constant 0 : i32
    %c0_i32_0 = arith.constant 0 : i32
    %c0_i32_1 = arith.constant 0 : i32
    return %arg0, %c0_i32, %c0_i32_0 : i32, i32, i32
  }
  func.func @transform_2(%arg0: i32, %arg1: memref<2xi32, #tpu.memory_space<smem>>) -> (i32, i32, i32) {
    %c0_i32 = arith.constant 0 : i32
    %c0_i32_0 = arith.constant 0 : i32
    %c0_i32_1 = arith.constant 0 : i32
    return %arg0, %c0_i32, %c0_i32_0 : i32, i32, i32
  }
  func.func @transform_3(%arg0: i32, %arg1: memref<2xi32, #tpu.memory_space<smem>>) -> (i32, i32) {
    %c0_i32 = arith.constant 0 : i32
    %c0_i32_0 = arith.constant 0 : i32
    %c0_i32_1 = arith.constant 0 : i32
    return %c0_i32, %c0_i32_0 : i32, i32
  }
  func.func @transform_4(%arg0: i32, %arg1: memref<2xi32, #tpu.memory_space<smem>>) -> (i32, i32) {
    %c0_i32 = arith.constant 0 : i32
    %c0_i32_0 = arith.constant 0 : i32
    %c0_i32_1 = arith.constant 0 : i32
    return %c0_i32, %c0_i32_0 : i32, i32
  }
  func.func @transform_5(%arg0: i32, %arg1: memref<2xi32, #tpu.memory_space<smem>>) -> (i32, i32) {
    %c0_i32 = arith.constant 0 : i32
    %c0_i32_0 = arith.constant 0 : i32
    %c0_i32_1 = arith.constant 0 : i32
    return %c0_i32, %c0_i32_0 : i32, i32
  }
  func.func @transform_6(%arg0: i32, %arg1: memref<2xi32, #tpu.memory_space<smem>>) -> (i32, i32) {
    %c0_i32 = arith.constant 0 : i32
    %c0_i32_0 = arith.constant 0 : i32
    %c0_i32_1 = arith.constant 0 : i32
    return %c0_i32, %c0_i32_0 : i32, i32
  }
  func.func @transform_7(%arg0: i32, %arg1: memref<2xi32, #tpu.memory_space<smem>>) -> (i32, i32) {
    %c0_i32 = arith.constant 0 : i32
    %c0_i32_0 = arith.constant 0 : i32
    %c0_i32_1 = arith.constant 0 : i32
    return %c0_i32, %c0_i32_0 : i32, i32
  }
  func.func @transform_8(%arg0: i32, %arg1: memref<2xi32, #tpu.memory_space<smem>>) -> (i32, i32) {
    %c0_i32 = arith.constant 0 : i32
    %c0_i32_0 = arith.constant 0 : i32
    %c0_i32_1 = arith.constant 0 : i32
    return %c0_i32, %c0_i32_0 : i32, i32
  }
  func.func @transform_9(%arg0: i32, %arg1: memref<2xi32, #tpu.memory_space<smem>>) -> (i32, i32) {
    %c0_i32 = arith.constant 0 : i32
    %c0_i32_0 = arith.constant 0 : i32
    %c0_i32_1 = arith.constant 0 : i32
    return %c0_i32, %c0_i32_0 : i32, i32
  }
  func.func @transform_10(%arg0: i32, %arg1: memref<2xi32, #tpu.memory_space<smem>>) -> (i32, i32) {
    %c0_i32 = arith.constant 0 : i32
    %c0_i32_0 = arith.constant 0 : i32
    %c0_i32_1 = arith.constant 0 : i32
    return %c0_i32, %c0_i32_0 : i32, i32
  }
  func.func @transform_11(%arg0: i32, %arg1: memref<2xi32, #tpu.memory_space<smem>>) -> (i32, i32) {
    %c0_i32 = arith.constant 0 : i32
    %c0_i32_0 = arith.constant 0 : i32
    %c0_i32_1 = arith.constant 0 : i32
    return %c0_i32, %c0_i32_0 : i32, i32
  }
  func.func @transform_12(%arg0: i32, %arg1: memref<2xi32, #tpu.memory_space<smem>>) -> (i32, i32) {
    %c0_i32 = arith.constant 0 : i32
    %c0_i32_0 = arith.constant 0 : i32
    %c0_i32_1 = arith.constant 0 : i32
    return %c0_i32, %c0_i32_0 : i32, i32
  }
  func.func @transform_13(%arg0: i32, %arg1: memref<2xi32, #tpu.memory_space<smem>>) -> (i32, i32) {
    %c0_i32 = arith.constant 0 : i32
    %c0_i32_0 = arith.constant 0 : i32
    %c0_i32_1 = arith.constant 0 : i32
    return %c0_i32, %c0_i32_0 : i32, i32
  }
  func.func @transform_14(%arg0: i32, %arg1: memref<2xi32, #tpu.memory_space<smem>>) -> (i32, i32) {
    %c0_i32 = arith.constant 0 : i32
    %c0_i32_0 = arith.constant 0 : i32
    %c0_i32_1 = arith.constant 0 : i32
    return %c0_i32, %c0_i32_0 : i32, i32
  }
  func.func @transform_15(%arg0: i32, %arg1: memref<2xi32, #tpu.memory_space<smem>>) -> (i32, i32) {
    %c0_i32 = arith.constant 0 : i32
    %c0_i32_0 = arith.constant 0 : i32
    %c0_i32_1 = arith.constant 0 : i32
    return %c0_i32, %c0_i32_0 : i32, i32
  }
  func.func @transform_16(%arg0: i32, %arg1: memref<2xi32, #tpu.memory_space<smem>>) -> (i32, i32) {
    %c0_i32 = arith.constant 0 : i32
    %c0_i32_0 = arith.constant 0 : i32
    %c0_i32_1 = arith.constant 0 : i32
    return %c0_i32, %c0_i32_0 : i32, i32
  }
  func.func @transform_17(%arg0: i32, %arg1: memref<2xi32, #tpu.memory_space<smem>>) -> (i32, i32) {
    %c0_i32 = arith.constant 0 : i32
    %c0_i32_0 = arith.constant 0 : i32
    %c0_i32_1 = arith.constant 0 : i32
    return %c0_i32, %c0_i32_0 : i32, i32
  }
  func.func @transform_18(%arg0: i32, %arg1: memref<2xi32, #tpu.memory_space<smem>>) -> (i32, i32) {
    %c0_i32 = arith.constant 0 : i32
    %c0_i32_0 = arith.constant 0 : i32
    %c0_i32_1 = arith.constant 0 : i32
    return %c0_i32, %c0_i32_0 : i32, i32
  }
  func.func @transform_19(%arg0: i32, %arg1: memref<2xi32, #tpu.memory_space<smem>>) -> (i32, i32) {
    %c0_i32 = arith.constant 0 : i32
    %c0_i32_0 = arith.constant 0 : i32
    %c0_i32_1 = arith.constant 0 : i32
    return %c0_i32, %c0_i32_0 : i32, i32
  }
  func.func @transform_20(%arg0: i32, %arg1: memref<2xi32, #tpu.memory_space<smem>>) -> (i32, i32) {
    %c0_i32 = arith.constant 0 : i32
    %c0_i32_0 = arith.constant 0 : i32
    %c0_i32_1 = arith.constant 0 : i32
    return %c0_i32, %c0_i32_0 : i32, i32
  }
  func.func @transform_21(%arg0: i32, %arg1: memref<2xi32, #tpu.memory_space<smem>>) -> (i32, i32) {
    %c0_i32 = arith.constant 0 : i32
    %c0_i32_0 = arith.constant 0 : i32
    %c0_i32_1 = arith.constant 0 : i32
    return %c0_i32, %c0_i32_0 : i32, i32
  }
  func.func @transform_22(%arg0: i32, %arg1: memref<2xi32, #tpu.memory_space<smem>>) -> (i32, i32) {
    %c0_i32 = arith.constant 0 : i32
    %c0_i32_0 = arith.constant 0 : i32
    %c0_i32_1 = arith.constant 0 : i32
    return %c0_i32, %c0_i32_0 : i32, i32
  }
  func.func @transform_23(%arg0: i32, %arg1: memref<2xi32, #tpu.memory_space<smem>>) -> (i32, i32, i32) {
    %c0_i32 = arith.constant 0 : i32
    %c0_i32_0 = arith.constant 0 : i32
    %c0_i32_1 = arith.constant 0 : i32
    return %arg0, %c0_i32, %c0_i32_0 : i32, i32, i32
  }
}

</mosaic_0001>

<bundles_post_ra>
// kernel: tpu_custom_call.1
= control target key start
LH: loop header
LB: loop body
LE: loop exit
PB: predicated region body
PF: predicated region fallthrough
CT: control target
= control target key end

     0   :  { %s4154_s0 = inlined_call_operand.vmem [shape: s32[2], index: 0, kind: input, shape index: {}]   ;;  %s4155_s1 = inlined_call_operand.vmem [shape: f32[2,8,32], index: 1, kind: input, shape index: {}]   ;;  %s4156_s2 = inlined_call_operand.vmem [shape: f32[2,12,32], index: 2, kind: input, shape index: {}]   ;;  %s4157_s3 = inlined_call_operand.vmem [shape: f32[2,10,32], index: 3, kind: input, shape index: {}]   ;;  %s4158_s4 = inlined_call_operand.vmem [shape: bf16[32,32], index: 4, kind: input, shape index: {}]   ;;  %s4159_s5 = inlined_call_operand.hbm [shape: f32[1,32], index: 5, kind: input, shape index: {}]   ;;  %s4160_s6 = inlined_call_operand.vmem [shape: bf16[32,32], index: 6, kind: input, shape index: {}]   ;;  %s4161_s7 = inlined_call_operand.hbm [shape: f32[1,32], index: 7, kind: input, shape index: {}]   ;;  %s4162_s8 = inlined_call_operand.vmem [shape: bf16[32,32], index: 8, kind: input, shape index: {}]   ;;  %s4163_s9 = inlined_call_operand.hbm [shape: f32[1,32], index: 9, kind: input, shape index: {}]   ;;  %s4164_s10 = inlined_call_operand.vmem [shape: bf16[32,32], index: 10, kind: input, shape index: {}]   ;;  %s4165_s11 = inlined_call_operand.hbm [shape: f32[1,32], index: 11, kind: input, shape index: {}]   ;;  %s4166_s12 = inlined_call_operand.vmem [shape: bf16[32,32], index: 12, kind: input, shape index: {}]   ;;  %s4167_s13 = inlined_call_operand.hbm [shape: f32[1,32], index: 13, kind: input, shape index: {}]   ;;  %s4168_s14 = inlined_call_operand.vmem [shape: bf16[32,32], index: 14, kind: input, shape index: {}]   ;;  %s4169_s15 = inlined_call_operand.hbm [shape: f32[1,32], index: 15, kind: input, shape index: {}]   ;;  %s4170_s16 = inlined_call_operand.vmem [shape: bf16[32,32], index: 16, kind: input, shape index: {}]   ;;  %s4171_s17 = inlined_call_operand.vmem [shape: f32[1,32], index: 17, kind: input, shape index: {}]   ;;  %s4172_s18 = inlined_call_operand.vmem [shape: bf16[32,32], index: 18, kind: input, shape index: {}]   ;;  %s4173_s19 = inlined_call_operand.vmem [shape: f32[1,32], index: 19, kind: input, shape index: {}]   ;;  %s4174_s20 = inlined_call_operand.hbm [shape: bf16[32,64], index: 20, kind: input, shape index: {}]   ;;  %s4175_s21 = inlined_call_operand.vmem [shape: f32[1,64], index: 21, kind: input, shape index: {}]   ;;  %s4176_s22 = inlined_call_operand.vmem [shape: bf16[64,32], index: 22, kind: input, shape index: {}]   ;;  %s4177_s23 = inlined_call_operand.vmem [shape: f32[1,32], index: 23, kind: input, shape index: {}]   ;;  %s4178_s24 = inlined_call_operand.hbm [shape: f32[2,8,32], index: 24, kind: output, shape index: {}]  }
   0x1   :  { %4196 = sst [smem:[#allocation30_spill]] %s4154_s0 }
   0x2   :  { %4197 = sst [smem:[#allocation31_spill]] %s4155_s1 }
   0x3   :  { %4198 = sst [smem:[#allocation32_spill]] %s4156_s2 }
   0x4   :  { %4199 = sst [smem:[#allocation33_spill]] %s4157_s3 }
   0x5   :  { %4200 = sst [smem:[#allocation34_spill]] %s4158_s4 }
   0x6   :  { %4201 = sst [smem:[#allocation35_spill]] %s4159_s5 }
   0x7   :  { %4202 = sst [smem:[#allocation36_spill]] %s4160_s6 }
   0x8   :  { %4203 = sst [smem:[#allocation37_spill]] %s4161_s7 }
   0x9   :  { %4204 = sst [smem:[#allocation38_spill]] %s4162_s8 }
   0xa   :  { %4205 = sst [smem:[#allocation39_spill]] %s4163_s9 }
   0xb   :  { %4206 = sst [smem:[#allocation40_spill]] %s4165_s11 }
   0xc   :  { %4207 = sst [smem:[#allocation41_spill]] %s4167_s13 }
   0xd   :  { %4208 = sst [smem:[#allocation42_spill]] %s4169_s15 }
   0xe   :  { %4209 = sst [smem:[#allocation43_spill]] %s4172_s18 }
   0xf   :  { %4210 = sst [smem:[#allocation44_spill]] %s4174_s20 }
  0x10   :  { %4211 = sst [smem:[#allocation45_spill]] %s4178_s24 }
  0x11   :  { %s4212_s27 = sld [smem:[#allocation30_spill]] }
  0x17   :  { %s29_s18 = sshll.u32 %s4212_s27, 4  ;;  %s30_s18 = int_to_ptr.vmem [resolvable:$true] %s29_s18 }
  0x18   :  { %s3266_s28 = scalar_lea.vmem %s30_s18, 16  ;;  %p3271_p1 = scmp.lt.s32.totalorder %s30_s18, %s30_s18 }
  0x19   :  { %p3267_p0 = scmp.ne.s32.totalorder %s30_s18, %s3266_s28  ;;  %p3272_p2 = scmp.lt.s32.totalorder %s3266_s28, %s3266_s28 }
  0x1b   :  { %p3273_p3 = por %p3272_p2, %p3271_p1 }
  0x1d   :  { %p3274_p4 = pnand %p3273_p3, %p3267_p0 }
  0x1f   :  { %3277 = shalt.err (!%p3274_p4)  }
  0x20   :  { %s3540_s6 = smov [#allocation3]  }
  0x21   :  { %32 = dma.vmem_to_smem %s30_s18, 16, %s3540_s6, [#allocation2] }
  0x22   :  { %3502 = dma.done.wait [#allocation2], 16 }
  0x23   :  { %3503 = vsyncadd [#allocation2], 4294967280 }
  0x24   :  { %34 = sfence }
  0x25   :  { %35 = vsyncpa [#allocation5], 0 }
  0x26   :  { %36 = vsyncpa [#allocation8], 0 }
  0x27   :  { %37 = vsyncpa [#allocation11], 0 }
  0x28   :  { %38 = vsyncpa [#allocation14], 0 }
  0x29   :  { %39 = vsyncpa [#allocation6], 0 }
  0x2a   :  { %41 = vsyncpa [#allocation6 + $0x1], 0  ;;  %s3688_s2 = smov 0   ;;  %s3690_s29 = smov 0  }
  0x2b   :  { %s3692_s0 = smov 0   ;;  %s3694_s7 = smov 0  }
  0x2c LB: > { %4213 = sst [smem:[#allocation23_spill]] %s3526_s2  ;;  %s3709_s18 = sadd.s32 4294967295, %s3538_s7   ;;  %s3538_s7 = sphi %s3694_s7, %s4257_s7   ;;  %s3534_s0 = sphi %s3692_s0, %s4259_s0   ;;  %s3530_s29 = sphi %s3690_s29, %s4261_s29   ;;  %s3526_s2 = sphi %s3688_s2, %s4260_s2  }
  0x2d   : > { %4214 = sst [smem:[#allocation24_spill]] %s3534_s0  ;;  %s2734_s30 = sadd.s32 4294967294, %s3538_s7  }
  0x2e   : > { %4215 = sst [smem:[#allocation25_spill]] %s3538_s7  ;;  %s3713_s3 = sadd.s32 1, %s3538_s7  }
  0x2f   : > { %4216 = sst [smem:[#allocation26_spill]] %s3713_s3  ;;  %s552_s25 = sadd.s32 1, %s3534_s0 }
  0x30   : > { %s549_s8 = ssub.s32 %s3538_s7, %s3713_s3  ;;  %p562_p5 = scmp.ne.s32.totalorder %s3534_s0, %s3530_s29 }
  0x31   : > { %p550_p6 = scmp.eq.s32.totalorder %s549_s8, 0  ;;  %p563_p7 = scmp.eq.s32.totalorder %s3709_s18, 1 }
  0x32   : > { %p568_p8 = scmp.ne.s32.totalorder %s3530_s29, %s3526_s2  ;;  %p569_p9 = scmp.eq.s32.totalorder %s2734_s30, 1 }
  0x33   : > { %s3724_s4 = scalar_select %p550_p6, %s3534_s0, %s552_s25  }
  0x34   : > { %p3726_p10 = por %p563_p7, %p562_p5  ;;  %p3730_p11 = por %p569_p9, %p568_p8 }
  0x35   : > { %4217 = sst [smem:[#allocation27_spill]] %s3724_s4  ;;  %p2735_p12 = scmp.ge.s32.totalorder %s3538_s7, 1 }
  0x36   : > { %s4218_s1 = scalar_select %p3726_p10, 1, 0 }
  0x37   : > { %s4220_s5 = scalar_select %p3730_p11, 1, 0 }
  0x38   : > { %4219 = sst [smem:[#allocation28_spill]] %s4218_s1  ;;  %p576_p13 = scmp.lt.s32.totalorder %s3538_s7, 3 }
  0x39   : > { %4221 = sst [smem:[#allocation29_spill]] %s4220_s5  ;;  %p4188_p0 = scmp.eq.s32.totalorder %s3709_s18, 0 }
  0x3a   : > { %p3737_p1 = pnand %p2735_p12, %p576_p13  ;;  %s3541_s27 = smov [#allocation7]  }
  0x3b   : > { %s606_s28 = sshll.u32 %s3541_s27, 4  ;;  %s3542_s6 = smov [#allocation10]   ;;  %s607_s28 = int_to_ptr.vmem [resolvable:$true] %s606_s28 }
  0x3c   : > { %s4222_s26 = scalar_select %p3737_p1, 1, 0 }
  0x3d   : > { %p3114_p2 = pneg %p3737_p1  ;;  %s634_s30 = sshll.u32 %s3542_s6, 4  ;;  %s635_s30 = int_to_ptr.vmem [resolvable:$true] %s634_s30 }
  0x3e   : > { %s3543_s8 = smov [#allocation13]   ;;  %s3289_s27 = scalar_lea.vmem %s607_s28, 16 }
  0x3f   : > { %p3745_p3 = pnand %p4188_p0, %p3114_p2  ;;  %s662_s4 = sshll.u32 %s3543_s8, 4  ;;  %s3749_s4 = int_to_ptr.vmem [resolvable:$true] %s662_s4 }
  0x40   : > { %p3290_p5 = scmp.ne.s32.totalorder %s607_s28, %s3289_s27  ;;  %s3296_s6 = scalar_lea.vmem %s607_s28, 32 }
  0x41   : > { %p3753_p4 = pneg %p3745_p3  ;;  %p3297_p8 = scmp.lt.s32.totalorder %s607_s28, %s607_s28 }
  0x42   : > { %p3298_p9 = scmp.lt.s32.totalorder %s3296_s6, %s3289_s27 }
  0x43   : > { %p3292_p6 = pnand %p3290_p5, %p3753_p4 }
  0x44   : > { %p3299_p12 = por %p3298_p9, %p3297_p8 }
  0x45   : > { %p3293_p7 = pneg %p3292_p6 }
  0x47   : > { %p3300_p13 = pnand %p3299_p12, %p3293_p7 }
  0x49   : > { %3303 = shalt.err (!%p3300_p13)
}
  0x4a   : > { %s4225_s5 = sld [smem:[#allocation37_spill]]  ;;  %s3315_s2 = scalar_lea.vmem %s635_s30, 16 }
  0x4b   : > { %p3316_p2 = scmp.ne.s32.totalorder %s635_s30, %s3315_s2  ;;  %s3322_s7 = scalar_lea.vmem %s635_s30, 32 }
  0x4c   : > { %p3323_p5 = scmp.lt.s32.totalorder %s635_s30, %s635_s30  ;;  %p3324_p6 = scmp.lt.s32.totalorder %s3322_s7, %s3315_s2 }
  0x4d   : > { %p3318_p0 = pnand %p3316_p2, %p3753_p4 }
  0x4e   : > { %p3325_p10 = por %p3324_p6, %p3323_p5 }
  0x4f   : > { %p3319_p11 = pneg %p3318_p0 }
  0x50   : > { %3120 = dma.hbm_to_vmem [thread:$0]  (!%p3745_p3), %s4225_s5, 16, %s607_s28, [#allocation8]  }
  0x51   : > { %p3326_p1 = pnand %p3325_p10, %p3319_p11 }
  0x53   : > { %3329 = shalt.err (!%p3326_p1)
}
  0x54   : > { %s4226_s11 = sld [smem:[#allocation40_spill]]  ;;  %s3341_s3 = scalar_lea.vmem %s3749_s4, 16 }
  0x55   : > { %p3342_p7 = scmp.ne.s32.totalorder %s3749_s4, %s3341_s3  ;;  %s3348_s2 = scalar_lea.vmem %s3749_s4, 32 }
  0x56   : > { %p3349_p10 = scmp.lt.s32.totalorder %s3749_s4, %s3749_s4  ;;  %p3350_p11 = scmp.lt.s32.totalorder %s3348_s2, %s3341_s3 }
  0x57   : > { %p3344_p0 = pnand %p3342_p7, %p3753_p4 }
  0x58   : > { %p3351_p1 = por %p3350_p11, %p3349_p10 }
  0x59   : > { %p3345_p8 = pneg %p3344_p0 }
  0x5a   : > { %3126 = dma.hbm_to_vmem [thread:$0]  (!%p3745_p3), %s4226_s11, 16, %s635_s30, [#allocation11]  }
  0x5b   : > { %p3352_p9 = pnand %p3351_p1, %p3345_p8 }
  0x5d   : > { %3355 = shalt.err (!%p3352_p9)
}
  0x5e   : > { %s4227_s15 = sld [smem:[#allocation42_spill]]  ;;  %s3544_s28 = smov [#allocation4]  }
  0x5f   : > { %s592_s30 = sshll.u32 %s3544_s28, 4  ;;  %s3545_s8 = smov [#allocation9]   ;;  %s593_s30 = int_to_ptr.vmem [resolvable:$true] %s592_s30 }
  0x60   : > { %s620_s27 = sshll.u32 %s3545_s8, 4  ;;  %s3367_s6 = scalar_lea.vmem %s593_s30, 16  ;;  %s621_s27 = int_to_ptr.vmem [resolvable:$true] %s620_s27 }
  0x61   : > { %p3368_p12 = scmp.ne.s32.totalorder %s593_s30, %s3367_s6  ;;  %s3374_s3 = scalar_lea.vmem %s593_s30, 32 }
  0x62   : > { %p3375_p5 = scmp.lt.s32.totalorder %s593_s30, %s593_s30  ;;  %p3376_p6 = scmp.lt.s32.totalorder %s3374_s3, %s3367_s6 }
  0x63   : > { %p3370_p13 = pnand %p3368_p12, %p3753_p4 }
  0x64   : > { %3132 = dma.hbm_to_vmem [thread:$0]  (!%p3745_p3), %s4227_s15, 16, %s3749_s4, [#allocation14]  }
  0x65   : > { %p3371_p2 = pneg %p3370_p13  ;;  %p3377_p7 = por %p3376_p6, %p3375_p5 }
  0x67   : > { %p3378_p0 = pnand %p3377_p7, %p3371_p2 }
  0x69   : > { %3381 = shalt.err (!%p3378_p0)
}
  0x6a   : > { %s4228_s7 = sld [smem:[#allocation35_spill]]  ;;  %s3393_s5 = scalar_lea.vmem %s621_s27, 16 }
  0x6b   : > { %p3394_p8 = scmp.ne.s32.totalorder %s621_s27, %s3393_s5  ;;  %s3400_s28 = scalar_lea.vmem %s621_s27, 32 }
  0x6c   : > { %p3401_p1 = scmp.lt.s32.totalorder %s621_s27, %s621_s27  ;;  %p3402_p9 = scmp.lt.s32.totalorder %s3400_s28, %s3393_s5 }
  0x6d   : > { %p3396_p10 = pnand %p3394_p8, %p3753_p4 }
  0x6e   : > { %p3403_p12 = por %p3402_p9, %p3401_p1 }
  0x6f   : > { %p3397_p11 = pneg %p3396_p10 }
  0x70   : > { %3117 = dma.hbm_to_vmem [thread:$0]  (!%p3745_p3), %s4228_s7, 16, %s593_s30, [#allocation5]  }
  0x71   : > { %p3404_p13 = pnand %p3403_p12, %p3397_p11 }
  0x73   : > { %3407 = shalt.err (!%p3404_p13)
}
  0x74   : > { %s4229_s9 = sld [smem:[#allocation39_spill]]  ;;  %s3546_s30 = smov [#allocation12]  }
  0x75   : > { %s648_s3 = sshll.u32 %s3546_s30, 4  ;;  %s3547_s2 = smov [#allocation15]   ;;  %s649_s3 = int_to_ptr.vmem [resolvable:$true] %s648_s3 }
  0x76   : > { %s684_s4 = sshll.u32 %s3547_s2, 4  ;;  %s3419_s7 = scalar_lea.vmem %s649_s3, 16  ;;  %s685_s4 = int_to_ptr.vmem [resolvable:$true] %s684_s4 }
  0x77   : > { %p3420_p2 = scmp.ne.s32.totalorder %s649_s3, %s3419_s7  ;;  %s3426_s5 = scalar_lea.vmem %s649_s3, 32 }
  0x78   : > { %p3427_p7 = scmp.lt.s32.totalorder %s649_s3, %s649_s3  ;;  %p3428_p0 = scmp.lt.s32.totalorder %s3426_s5, %s3419_s7 }
  0x79   : > { %p3422_p5 = pnand %p3420_p2, %p3753_p4 }
  0x7a   : > { %3123 = dma.hbm_to_vmem [thread:$0]  (!%p3745_p3), %s4229_s9, 16, %s621_s27, [#allocation8]  }
  0x7b   : > { %p3423_p6 = pneg %p3422_p5  ;;  %p3429_p8 = por %p3428_p0, %p3427_p7 }
  0x7d   : > { %p3430_p10 = pnand %p3429_p8, %p3423_p6 }
  0x7f   : > { %3433 = shalt.err (!%p3430_p10)
}
  0x80   : > { %s4230_s13 = sld [smem:[#allocation41_spill]]  ;;  %s3445_s8 = scalar_lea.vmem %s685_s4, 256 }
  0x81   : > { %p3446_p11 = scmp.ne.s32.totalorder %s685_s4, %s3445_s8  ;;  %p3453_p12 = scmp.lt.s32.totalorder %s685_s4, %s685_s4 }
  0x82   : > { %p3454_p13 = scmp.lt.s32.totalorder %s3445_s8, %s3445_s8 }
  0x83   : > { %p3448_p1 = pnand %p3446_p11, %p3753_p4 }
  0x84   : > { %p3455_p2 = por %p3454_p13, %p3453_p12 }
  0x85   : > { %p3449_p9 = pneg %p3448_p1 }
  0x86   : > { %3129 = dma.hbm_to_vmem [thread:$0]  (!%p3745_p3), %s4230_s13, 16, %s649_s3, [#allocation11]  }
  0x87   : > { %p3456_p5 = pnand %p3455_p2, %p3449_p9 }
  0x89   : > { %3459 = shalt.err (!%p3456_p5)
}
  0x8a   : > { %s3548_s6 = smov 64   ;;  %s3549_s30 = smov 4  }
  0x8b   : > { %s4231_s20 = sld [smem:[#allocation44_spill]]  ;;  %p4232_p6 = scmp.ne.s32.totalorder %s4222_s26, 0 }
  0x8c   : > { %p4233_p7 = scmp.eq.s32.totalorder (!%p4232_p6), %s3709_s18, 0 }
  0x8d   : > { %732 = sbr.rel (%p4232_p6) target bundleno = 4729 (0x1279), region = 112 }
  0x91   : > { %3135 = dma.hbm_to_vmem [thread:$0]  (!%p3745_p3), %s4231_s20, 256, %s685_s4, [#allocation14], %s3548_s6, %s3548_s6, %s3549_s30  }
  0x92   : > { %3505 = dma.done.wait (%p4233_p7), [#allocation5], 16   ;;  %p4234_p4 = pmov %p4233_p7 }
  0x94   : > { %3507 = vsyncadd (%p4234_p4), [#allocation5], 4294967280  ;;  %p4235_p0 = pmov %p4234_p4 }
  0x96   : > { %3509 = dma.done.wait (%p4235_p0), [#allocation8], 32   ;;  %p4236_p8 = pmov %p4235_p0 }
  0x97   : > { %p4237_p10 = pmov %p4235_p0 }
  0x98   : > { %3511 = vsyncadd (%p4236_p8), [#allocation8], 4294967264 }
  0x99   : > { %3513 = dma.done.wait (%p4237_p10), [#allocation11], 32   ;;  %p4238_p3 = pmov %p4235_p0 }
  0x9a   : > { %p4239_p11 = pmov %p4235_p0 }
  0x9b   : > { %3515 = vsyncadd (%p4238_p3), [#allocation11], 4294967264 }
  0x9c   : > { %3517 = dma.done.wait (%p4239_p11), [#allocation14], 272   ;;  %p4240_p1 = pmov %p4235_p0 }
  0x9d   : > { %p829_p9 = scmp.lt.s32.totalorder %s3709_s18, 1  ;;  %v3550_v0 = vmov 0.0   ;;  %vm3551_vm0 = vmmov 0   ;;  %s4241_s5 = sld [smem:[#allocation36_spill]]  ;;  %vm889_vm1 = vcmask 261120   ;;  %vm1058_vm2 = vcmask 64512  }
  0x9e   : > { %3519 = vsyncadd (%p4240_p1), [#allocation14], 4294967024  ;;  %2894 = vmatprep.subr.bf16.mxu1 %v3550_v0  ;;  %2886 = vmatprep.subr.bf16.mxu0 %v3550_v0  ;;  %s4242_s8 = sld [smem:[#allocation32_spill]]  ;;  %v2758_v10 = vld [vmem:[#allocation4] ss:$0 sm:$0xff]  ;;  %s3552_s11 = smov 112  }
  0x9f   : > { %2898 = vmatprep.mubr.msk.bf16.mxu1 %vm3551_vm0, %v3550_v0  ;;  %s3836_s0 = scalar_select %p829_p9, %s3709_s18, 1  ;;  %2890 = vmatprep.mubr.msk.bf16.mxu0 %vm3551_vm0, %v3550_v0  ;;  %v2762_v13 = vld [vmem:[#allocation7] ss:$0 sm:$0xff]  ;;  %vm1105_vm3 = vcmask 97280   ;;  %v2766_v43 = vld [vmem:[#allocation9] ss:$0 sm:$0xff] }
  0xa0   : > { %s4243_s7 = sld [smem:[#allocation34_spill]]  ;;  %s3553_s13 = smov 120   ;;  %vm1121_vm4 = vcmask 1045504   ;;  %vm1511_vm5 = vcmask 130048   ;;  %vm1513_vm6 = vcmask 195584   ;;  %vm1873_vm8 = vcmask 80896  }
  0xa1   : > { %s2820_s26 = sshll.u32 %s3836_s0, 4  ;;  %s2753_s25 = sshll.u32 %s3836_s0, 3  ;;  %vm1889_vm9 = vcmask 1044480   ;;  %vm2487_vm10 = vcmask 523264  }
  0xa2   : > { %s4245_s24 = sld [smem:[#allocation31_spill]]  ;;  %s3554_s15 = smov 104  }
  0xa3   : > { %v3206_v1 = vld [vmem:[%s4241_s5 + $0x8] sm:$0xff]   ;;  %v3208_v3 = vld [vmem:[%s4241_s5] sm:$0xff]   ;;  %s4195_s3 = smov 24   ;;  %s4247_s28 = sld [smem:[#allocation33_spill]] }
  0xa4   : > { %s837_s6 = scalar_lea.vmem %s4242_s8, %s2820_s26  ;;  %2895 = vmatpush3.bf16.msra.mxu1 %v3206_v1 }
  0xa5   : > { %2896 = vmatprep.subr.bf16.mxu1 %v3550_v0  ;;  %v845_v4 = vld [vmem:[%s837_s6] sm:$0xff]  ;;  %v846_v5 = vld [vmem:[%s837_s6 + $0x8] sm:$0xf]  ;;  %s3555_s6 = smov 8  }
  0xa6   : > { %s4244_s9 = smov %s4243_s7  ;;  %v3207_v2 = vld [vmem:[%s4243_s7 + $0x8] sm:$0xff]   ;;  %v870_v6 = vpack.c.bf16 %v846_v5, %v845_v4  ;;  %s3556_s7 = smov 16  }
  0xa7   : > { %2887 = vmatpush3.bf16.msra.mxu0 %v3207_v2  ;;  %v3209_v7 = vld [vmem:[%s4244_s9] sm:$0xff]  }
  0xa8   : > { %s832_s1 = scalar_lea.vmem %s4245_s24, %s2753_s25  ;;  %2888 = vmatprep.subr.bf16.mxu0 %v3550_v0  ;;  %2897 = vmatpush3.bf16.msra.mxu1 %v3208_v3 }
  0xa9   : > { %v3864_v8 = vld [vmem:[%s832_s1] sm:$0xff]  ;;  %2910 = vmatprep.subr.bf16.mxu1 %v3550_v0  ;;  %s4246_s1 = sld [smem:[#allocation38_spill]]  ;;  %s842_s27 = scalar_lea.vmem %s4247_s28, %s2820_s26 }
  0xaa   : > { %v869_v9 = vpack.c.bf16 %v3864_v8, %v3864_v8 }
  0xab   : > { %2889 = vmatpush3.bf16.msra.mxu0 %v3209_v7  ;;  %2899 = vmatmul.mubr.msk.bf16.vlgmr.msra.gmra.mxu1 %vm889_vm1, %v870_v6 }
  0xac   : > { %2902 = vmatprep.subr.bf16.mxu0 %v3550_v0  ;;  %2912 = vmatprep.mubr.msk.bf16.mxu1 %vm3551_vm0, %v3550_v0 }
  0xae   : > { %2891 = vmatmul.mubr.msk.bf16.vlgmr.msra.gmra.mxu0 %vm889_vm1, %v869_v9 }
  0xaf   : > { %2906 = vmatprep.mubr.msk.bf16.mxu0 %vm3551_vm0, %v3550_v0  ;;  %v3210_v27 = vld [vmem:[%s4246_s1 + $0x8] sm:$0xff]   ;;  %v3211_v28 = vld [vmem:[%s4246_s1] sm:$0xff]  }
  0xb0   : > { %2903 = vmatpush3.bf16.msra.mxu0 %v3210_v27 }
  0xb1   : > { %2904 = vmatprep.subr.bf16.mxu0 %v3550_v0 }
  0xb4   : > { %2905 = vmatpush3.bf16.msra.mxu0 %v3211_v28 }
  0xb5   : > { %2916 = vmatprep.subr.bf16.mxu0 %v3550_v0 }
  0xb7   : > { %2907 = vmatmul.mubr.msk.bf16.vlgmr.msra.gmra.mxu0 %vm889_vm1, %v870_v6 }
  0xb8   : > { %2918 = vmatprep.mubr.msk.bf16.mxu0 %vm3551_vm0, %v3550_v0 }
 0x16b   : > { %v988_v11 = vpop.f32.mrf.mxu1 }
 0x16c   : > { %v989_v18 = vadd.f32 %v2762_v13, %v988_v11 }
 0x16d   : > { %v2900_v14 = vpop.f32.mrf.mxu1 }
 0x16e   : > { %v927_v12 = vpop.f32.mrf.mxu0 }
 0x16f   : > { %v928_v15 = vadd.f32 %v2758_v10, %v927_v12  ;;  %v991_v17 = vpop.f32.mrf.mxu1 }
 0x170   : > { %v2892_v16 = vpop.f32.mrf.mxu0  ;;  %v992_v20 = vadd.f32 %v2762_v13, %v991_v17 }
 0x171   : > { %v1054_v19 = vmul.f32 0.35355338, %v928_v15  ;;  %v2901_v22 = vpop.f32.mrf.mxu1 }
 0x172   : > { %v930_v21 = vpop.f32.mrf.mxu0  ;;  %v1056_v23 = vpack.c.bf16 %v992_v20, %v989_v18 }
 0x173   : > { %v1055_v25 = vpack.c.bf16 %v1054_v19, %v1054_v19 }
 0x174   : > { %v2893_v24 = vpop.f32.mrf.mxu0  ;;  %1280 = vrot.lane.b32.xlu1 %v1056_v23, %s3552_s11  ;;  %1169 = vrot.lane.b32.xlu0 %v1056_v23, %s3553_s13  ;;  %v1063_v26 = vsel %vm1058_vm2, %v1056_v23, 0 }
 0x175   : > { %2911 = vmatpush3.bf16.xpose.msra.mxu1 %v1063_v26 }
 0x176   : > { %2922 = vmatprep.subr.bf16.mxu1 %v3550_v0 }
 0x177   : > { %v1047_v44 = vpop.f32.mrf.mxu0 }
 0x178   : > { %1278 = vrot.lane.b32.xlu1 %v1055_v25, %s3552_s11  ;;  %1166 = vrot.lane.b32.xlu0 %v1055_v25, %s3553_s13  ;;  %v1048_v46 = vadd.f32 %v2766_v43, %v1047_v44 }
 0x179   : > { %v2908_v45 = vpop.f32.mrf.mxu0 }
 0x17b   : > { %v1050_v47 = vpop.f32.mrf.mxu0 }
 0x17c   : > { %1388 = vrot.lane.b32.xlu1 %v1055_v25, %s3554_s15  ;;  %1390 = vrot.lane.b32.xlu0 %v1056_v23, %s3554_s15  ;;  %v1051_v48 = vadd.f32 %v2766_v43, %v1050_v47 }
 0x17d   : > { %2913 = vmatmul.mubr.msk.bf16.vlgmr.msra.gmra.mxu1 %vm1058_vm2, %v1055_v25  ;;  %v2909_v49 = vpop.f32.mrf.mxu0 }
 0x17e   : > { %2924 = vmatprep.mubr.msk.bf16.mxu1 %vm3551_vm0, %v3550_v0  ;;  %v1057_v50 = vpack.c.bf16 %v1051_v48, %v1048_v46 }
 0x180   : > { %v1123_v51 = vsel %vm1121_vm4, %v1057_v50, 0 }
 0x181   : > { %2917 = vmatpush3.bf16.msra.mxu0 %v1123_v51  ;;  %v3212_v51 = vld [vmem:[%s4164_s10 + $0x8] sm:$0xff]  }
 0x182   : > { %2928 = vmatprep.subr.bf16.mxu0 %v3550_v0 }
 0x1e6   : > { %v1170_v29 = vpop.permute.xlu0 %1169  ;;  %v1281_v31 = vpop.permute.xlu1 %1280 }
 0x1e7   : > { %v1175_v30 = vsel %vm1058_vm2, %v1170_v29, 0  ;;  %v1286_v33 = vsel %vm1058_vm2, %v1281_v31, 0 }
 0x1e8   : > { %2923 = vmatpush3.bf16.xpose.msra.mxu1 %v1175_v30 }
 0x1e9   : > { %2934 = vmatprep.subr.bf16.mxu1 %v3550_v0 }
 0x1ea   : > { %v1167_v32 = vpop.permute.xlu0 %1166  ;;  %v1279_v35 = vpop.permute.xlu1 %1278 }
 0x1ee   : > { %v1391_v34 = vpop.permute.xlu0 %1390  ;;  %v1389_v37 = vpop.permute.xlu1 %1388 }
 0x1ef   : > { %2925 = vmatmul.mubr.msk.bf16.vlgmr.msra.gmra.mxu1 %vm1058_vm2, %v1167_v32  ;;  %v1396_v36 = vsel %vm1058_vm2, %v1391_v34, 0 }
 0x1f0   : > { %2935 = vmatpush3.bf16.xpose.msra.mxu1 %v1286_v33  ;;  %2936 = vmatprep.mubr.msk.bf16.mxu1 %vm3551_vm0, %v3550_v0 }
 0x1f1   : > { %2946 = vmatprep.subr.bf16.mxu1 %v3550_v0 }
 0x1f7   : > { %2937 = vmatmul.mubr.msk.bf16.vlgmr.msra.gmra.mxu1 %vm1058_vm2, %v1279_v35 }
 0x1f8   : > { %2947 = vmatpush3.bf16.xpose.msra.mxu1 %v1396_v36  ;;  %2948 = vmatprep.mubr.msk.bf16.mxu1 %vm3551_vm0, %v3550_v0 }
 0x1f9   : > { %2958 = vmatprep.subr.bf16.mxu1 %v3550_v0 }
 0x1ff   : > { %2949 = vmatmul.mubr.msk.bf16.vlgmr.msra.gmra.mxu1 %vm1058_vm2, %v1389_v37 }
 0x200   : > { %2962 = vmatprep.mubr.msk.bf16.mxu1 %vm3551_vm0, %v3550_v0  ;;  %2959 = vmatpush3.bf16.msra.mxu1 %v3212_v51 }
 0x201   : > { %2960 = vmatprep.subr.bf16.mxu1 %v3550_v0 }
 0x23d   : > { %v1099_v38 = vpop.f32.mrf.mxu1 }
 0x23e   : > { %v1106_v39 = vsel %vm1105_vm3, %v1099_v38, -inf }
 0x23f   : > { %1107 = vmax.xlane.f32.xlu0 %v1106_v39  ;;  %v2914_v40 = vpop.f32.mrf.mxu1 }
 0x241   : > { %v1102_v41 = vpop.f32.mrf.mxu1 }
 0x243   : > { %v2915_v42 = vpop.f32.mrf.mxu1 }
 0x2af   : > { %v1211_v52 = vpop.f32.mrf.mxu1 }
 0x2b0   : > { %v1217_v53 = vsel %vm1105_vm3, %v1211_v52, -inf }
 0x2b1   : > { %1218 = vmax.xlane.f32.xlu1 %v1217_v53  ;;  %v2926_v54 = vpop.f32.mrf.mxu1 }
 0x2b2   : > { %v3213_v54 = vld [vmem:[%s4164_s10] sm:$0xff]  }
 0x2b3   : > { %v1214_v55 = vpop.f32.mrf.mxu1  ;;  %2961 = vmatpush3.bf16.msra.mxu1 %v3213_v54 }
 0x2b4   : > { %2974 = vmatprep.subr.bf16.mxu1 %v3550_v0 }
 0x2b5   : > { %v2927_v56 = vpop.f32.mrf.mxu1 }
 0x2b7   : > { %v1322_v57 = vpop.f32.mrf.mxu1 }
 0x2b8   : > { %v1328_v58 = vsel %vm1105_vm3, %v1322_v57, -inf }
 0x2b9   : > { %1329 = vmax.xlane.f32.xlu0 %v1328_v58  ;;  %v2938_v59 = vpop.f32.mrf.mxu1 }
 0x2bb   : > { %v1325_v60 = vpop.f32.mrf.mxu1 }
 0x2bd   : > { %v2939_v61 = vpop.f32.mrf.mxu1 }
 0x2bf   : > { %v1432_v62 = vpop.f32.mrf.mxu1 }
 0x2c0   : > { %v1438_v63 = vsel %vm1105_vm3, %v1432_v62, -inf }
 0x2c1   : > { %1439 = vmax.xlane.f32.xlu0 %v1438_v63  ;;  %v2950_v1 = vpop.f32.mrf.mxu1 }
 0x2c3   : > { %v1435_v2 = vpop.f32.mrf.mxu1 }
 0x2c5   : > { %v2951_v3 = vpop.f32.mrf.mxu1 }
 0x2c8   : > { %v1108_v4 = vpop.xlane.xlu0 %1107 }
 0x2c9   : > { %v1109_v5 = vsub.f32 %v1099_v38, %v1108_v4 }
 0x2cb   : > { %v1110_v6 = vmul.f32 1.442695, %v1109_v5 }
 0x2cd   : > { %3228 = vpow2.f32 %v1110_v6 }
 0x2da   : > { %v3229_v7 = vpop.eup %3228 }
 0x2db   : > { %v1112_v9 = vsel %vm1105_vm3, %v3229_v7, 0.0 }
 0x2dc   : > { %1113 = vadd.xlane.f32.xlu1 %v1112_v9 }
 0x2ed   : > { %1230 = vrot.lane.b32.xlu1 %v1057_v50, %s3553_s13 }
 0x33a   : > { %v1219_v10 = vpop.xlane.xlu1 %1218 }
 0x33b   : > { %v1220_v11 = vsub.f32 %v1211_v52, %v1219_v10  ;;  %v2778_v10 = vld [vmem:[#allocation10] ss:$0 sm:$0xff] }
 0x33d   : > { %v1221_v12 = vmul.f32 1.442695, %v1220_v11 }
 0x33f   : > { %3230 = vpow2.f32 %v1221_v12 }
 0x342   : > { %v1330_v13 = vpop.xlane.xlu0 %1329 }
 0x343   : > { %v1331_v14 = vsub.f32 %v1322_v57, %v1330_v13 }
 0x345   : > { %v1332_v15 = vmul.f32 1.442695, %v1331_v14 }
 0x347   : > { %3232 = vpow2.f32 %v1332_v15 }
 0x34a   : > { %v1440_v16 = vpop.xlane.xlu0 %1439 }
 0x34b   : > { %v1441_v17 = vsub.f32 %v1432_v62, %v1440_v16 }
 0x34c   : > { %v3231_v18 = vpop.eup %3230 }
 0x34d   : > { %v1442_v19 = vmul.f32 1.442695, %v1441_v17  ;;  %v1223_v20 = vsel %vm1105_vm3, %v3231_v18, 0.0 }
 0x34e   : > { %1224 = vadd.xlane.f32.xlu0 %v1223_v20 }
 0x34f   : > { %3234 = vpow2.f32 %v1442_v19 }
 0x354   : > { %v3233_v21 = vpop.eup %3232 }
 0x355   : > { %v1334_v22 = vsel %vm1105_vm3, %v3233_v21, 0.0 }
 0x356   : > { %1335 = vadd.xlane.f32.xlu1 %v1334_v22 }
 0x35c   : > { %v3235_v23 = vpop.eup %3234 }
 0x35d   : > { %v1444_v24 = vsel %vm1105_vm3, %v3235_v23, 0.0 }
 0x35e   : > { %1445 = vadd.xlane.f32.xlu0 %v1444_v24 }
 0x365   : > { %v1114_v25 = vpop.xlane.xlu1 %1113 }
 0x366   : > { %3236 = vrcp.f32 %v1114_v25 }
 0x367   : > { %1450 = vrot.lane.b32.xlu1 %v1057_v50, %s3554_s15 }
 0x369   : > { %v1231_v27 = vpop.permute.xlu1 %1230 }
 0x36a   : > { %v1236_v30 = vsel %vm1121_vm4, %v1231_v27, 0 }
 0x373   : > { %v3237_v26 = vpop.eup %3236 }
 0x374   : > { %1340 = vrot.lane.b32.xlu0 %v1057_v50, %s3552_s11  ;;  %v1116_v28 = vmul.f32 %v3237_v26, %v3229_v7 }
 0x376   : > { %v1117_v29 = vpack.c.bf16 %v1116_v28, %v1116_v28  ;;  %v3214_v28 = vld [vmem:[%s4168_s14 + $0x8] sm:$0xff]  }
 0x378   : > { %2919 = vmatmul.mubr.msk.bf16.vlgmr.msra.gmra.mxu0 %vm1105_vm3, %v1117_v29  ;;  %v3216_v29 = vld [vmem:[%s4166_s12 + $0x8] sm:$0xff]  }
 0x379   : > { %2929 = vmatpush3.bf16.msra.mxu0 %v1236_v30  ;;  %2930 = vmatprep.mubr.msk.bf16.mxu0 %vm3551_vm0, %v3550_v0  ;;  %v847_v30 = vld [vmem:[%s842_s27] sm:$0xff] }
 0x37a   : > { %2940 = vmatprep.subr.bf16.mxu0 %v3550_v0 }
 0x3d7   : > { %v1225_v31 = vpop.xlane.xlu0 %1224 }
 0x3d8   : > { %3238 = vrcp.f32 %v1225_v31  ;;  %v848_v31 = vld [vmem:[%s842_s27 + $0x8] sm:$0x3] }
 0x3df   : > { %v1336_v32 = vpop.xlane.xlu1 %1335 }
 0x3e0   : > { %3240 = vrcp.f32 %v1336_v32  ;;  %v3215_v32 = vld [vmem:[%s4168_s14] sm:$0xff]  }
 0x3e3   : > { %v1451_v41 = vpop.permute.xlu1 %1450 }
 0x3e4   : > { %v1456_v43 = vsel %vm1121_vm4, %v1451_v41, 0 }
 0x3e5   : > { %v3239_v33 = vpop.eup %3238 }
 0x3e6   : > { %v1227_v34 = vmul.f32 %v3239_v33, %v3231_v18  ;;  %v3980_v33 = vpack.c.bf16 %v848_v31, %v847_v30 }
 0x3e7   : > { %v1446_v35 = vpop.xlane.xlu0 %1445 }
 0x3e8   : > { %3242 = vrcp.f32 %v1446_v35  ;;  %v1228_v36 = vpack.c.bf16 %v1227_v34, %v1227_v34 }
 0x3ea   : > { %2931 = vmatmul.mubr.msk.bf16.vlgmr.msra.gmra.mxu0 %vm1105_vm3, %v1228_v36 }
 0x3eb   : > { %v1341_v37 = vpop.permute.xlu0 %1340  ;;  %2942 = vmatprep.mubr.msk.bf16.mxu0 %vm3551_vm0, %v3550_v0 }
 0x3ec   : > { %v1346_v38 = vsel %vm1121_vm4, %v1341_v37, 0 }
 0x3ed   : > { %v3241_v39 = vpop.eup %3240  ;;  %2941 = vmatpush3.bf16.msra.mxu0 %v1346_v38  ;;  %v3217_v38 = vld [vmem:[%s4166_s12] sm:$0xff]  }
 0x3ee   : > { %2952 = vmatprep.subr.bf16.mxu0 %v3550_v0  ;;  %v1338_v40 = vmul.f32 %v3241_v39, %v3233_v21 }
 0x3f0   : > { %v1339_v42 = vpack.c.bf16 %v1338_v40, %v1338_v40 }
 0x3f2   : > { %2943 = vmatmul.mubr.msk.bf16.vlgmr.msra.gmra.mxu0 %vm1105_vm3, %v1339_v42 }
 0x3f3   : > { %2953 = vmatpush3.bf16.msra.mxu0 %v1456_v43  ;;  %2954 = vmatprep.mubr.msk.bf16.mxu0 %vm3551_vm0, %v3550_v0 }
 0x3f4   : > { %2966 = vmatprep.subr.bf16.mxu0 %v3550_v0 }
 0x3f5   : > { %v3243_v44 = vpop.eup %3242 }
 0x3f6   : > { %v1448_v45 = vmul.f32 %v3243_v44, %v3235_v23 }
 0x3f8   : > { %v1449_v46 = vpack.c.bf16 %v1448_v45, %v1448_v45 }
 0x3fa   : > { %2955 = vmatmul.mubr.msk.bf16.vlgmr.msra.gmra.mxu0 %vm1105_vm3, %v1449_v46 }
 0x3fb   : > { %2970 = vmatprep.mubr.msk.bf16.mxu0 %vm3551_vm0, %v3550_v0  ;;  %2967 = vmatpush3.bf16.msra.mxu0 %v3216_v29 }
 0x3fc   : > { %2968 = vmatprep.subr.bf16.mxu0 %v3550_v0 }
 0x3ff   : > { %2969 = vmatpush3.bf16.msra.mxu0 %v3217_v38 }
 0x400   : > { %2982 = vmatprep.subr.bf16.mxu0 %v3550_v0 }
 0x438   : > { %v1159_v47 = vpop.f32.mrf.mxu0 }
 0x43a   : > { %v2920_v48 = vpop.f32.mrf.mxu0 }
 0x43c   : > { %v1162_v49 = vpop.f32.mrf.mxu0 }
 0x43e   : > { %v2921_v50 = vpop.f32.mrf.mxu0 }
 0x4aa   : > { %v1272_v52 = vpop.f32.mrf.mxu0 }
 0x4ab   : > { %1499 = vrot.lane.b32.xlu1 %v1272_v52, %s3555_s6 }
 0x4ac   : > { %v2932_v53 = vpop.f32.mrf.mxu0 }
 0x4ae   : > { %v1275_v55 = vpop.f32.mrf.mxu0 }
 0x4b0   : > { %v2933_v56 = vpop.f32.mrf.mxu0 }
 0x4b1   : > { %v2782_v56 = vld [vmem:[#allocation12] ss:$0 sm:$0xff] }
 0x4b2   : > { %v1382_v57 = vpop.f32.mrf.mxu0 }
 0x4b3   : > { %1503 = vrot.lane.b32.xlu0 %v1382_v57, %s3556_s7 }
 0x4b4   : > { %v2944_v58 = vpop.f32.mrf.mxu0 }
 0x4b6   : > { %v1385_v59 = vpop.f32.mrf.mxu0 }
 0x4b8   : > { %v2945_v60 = vpop.f32.mrf.mxu0 }
 0x4ba   : > { %v1492_v61 = vpop.f32.mrf.mxu0 }
 0x4bb   : > { %1507 = vrot.lane.b32.xlu1 %v1492_v61, %s4195_s3 }
 0x4bc   : > { %v2956_v62 = vpop.f32.mrf.mxu0 }
 0x4be   : > { %v1495_v63 = vpop.f32.mrf.mxu0 }
 0x4c0   : > { %v2957_v1 = vpop.f32.mrf.mxu0 }
 0x51d   : > { %v1500_v2 = vpop.permute.xlu1 %1499 }
 0x51e   : > { %v1510_v4 = vsel %vm1058_vm2, %v1159_v47, %v1500_v2  ;;  %v2786_v47 = vld [vmem:[#allocation13] ss:$0 sm:$0xff] }
 0x525   : > { %v1504_v3 = vpop.permute.xlu0 %1503 }
 0x526   : > { %v1512_v5 = vsel %vm1511_vm5, %v1510_v4, %v1504_v3  ;;  %v3218_v3 = vld [vmem:[%s4170_s16 + $0x8] sm:$0xff]   ;;  %v3219_v4 = vld [vmem:[%s4170_s16] sm:$0xff]  }
 0x52d   : > { %v1508_v6 = vpop.permute.xlu1 %1507 }
 0x52e   : > { %v1514_v7 = vsel %vm1513_vm6, %v1512_v5, %v1508_v6 }
 0x52f   : > { %v1515_v9 = vpack.c.bf16 %v1514_v7, %v1514_v7 }
 0x531   : > { %2963 = vmatmul.mubr.msk.bf16.vlgmr.msra.gmra.mxu1 %vm889_vm1, %v1515_v9 }
 0x532   : > { %2978 = vmatprep.mubr.msk.bf16.mxu1 %vm3551_vm0, %v3550_v0  ;;  %2975 = vmatpush3.bf16.msra.mxu1 %v3214_v28 }
 0x533   : > { %2976 = vmatprep.subr.bf16.mxu1 %v3550_v0 }
 0x536   : > { %2977 = vmatpush3.bf16.msra.mxu1 %v3215_v32 }
 0x537   : > { %2990 = vmatprep.subr.bf16.mxu1 %v3550_v0 }
 0x539   : > { %2979 = vmatmul.mubr.msk.bf16.vlgmr.msra.gmra.mxu1 %vm889_vm1, %v3980_v33 }
 0x53a   : > { %2992 = vmatprep.mubr.msk.bf16.mxu1 %vm3551_vm0, %v3550_v0 }
 0x5f1   : > { %v1571_v11 = vpop.f32.mrf.mxu1 }
 0x5f2   : > { %v1572_v12 = vadd.f32 %v2778_v10, %v1571_v11 }
 0x5f3   : > { %v2964_v13 = vpop.f32.mrf.mxu1 }
 0x5f4   : > { %v1577_v14 = vadd.f32 %v1572_v12, %v3864_v8  ;;  %v1614_v13 = vlaneseq }
 0x5f5   : > { %v1574_v15 = vpop.f32.mrf.mxu1 }
 0x5f6   : > { %v1578_v16 = vsel %vm889_vm1, %v1577_v14, 0.0 }
 0x5f7   : > { %1579 = vadd.xlane.f32.xlu0 %v1578_v16  ;;  %v2965_v17 = vpop.f32.mrf.mxu1  ;;  %v3558_v16 = vmov -1000000.0  }
 0x5f9   : > { %v1757_v48 = vpop.f32.mrf.mxu1 }
 0x5fa   : > { %v1758_v50 = vadd.f32 %v2786_v47, %v1757_v48 }
 0x5fb   : > { %v2980_v49 = vpop.f32.mrf.mxu1 }
 0x5fd   : > { %v1760_v51 = vpop.f32.mrf.mxu1 }
 0x5fe   : > { %v1761_v52 = vadd.f32 %v2786_v47, %v1760_v51 }
 0x5ff   : > { %v2981_v53 = vpop.f32.mrf.mxu1 }
 0x600   : > { %v1825_v54 = vpack.c.bf16 %v1761_v52, %v1758_v50 }
 0x602   : > { %v1831_v55 = vsel %vm1058_vm2, %v1825_v54, 0 }
 0x603   : > { %2991 = vmatpush3.bf16.xpose.msra.mxu1 %v1831_v55 }
 0x604   : > { %3002 = vmatprep.subr.bf16.mxu1 %v3550_v0 }
 0x60d   : > { %1937 = vrot.lane.b32.xlu0 %v1825_v54, %s3553_s13 }
 0x611   : > { %2048 = vrot.lane.b32.xlu0 %v1825_v54, %s3552_s11 }
 0x615   : > { %2158 = vrot.lane.b32.xlu0 %v1825_v54, %s3554_s15 }
 0x680   : > { %v1580_v18 = vpop.xlane.xlu0 %1579 }
 0x681   : > { %v1581_v19 = vrot.slane %v1580_v18, 4 }
 0x683   : > { %v1582_v20 = vadd.f32 %v1581_v19, %v1580_v18 }
 0x684   : > { %v1938_v62 = vpop.permute.xlu0 %1937 }
 0x685   : > { %v1583_v21 = vrot.slane %v1582_v20, 2  ;;  %v1943_v1 = vsel %vm1058_vm2, %v1938_v62, 0 }
 0x687   : > { %v1584_v22 = vadd.f32 %v1583_v21, %v1582_v20 }
 0x688   : > { %v2049_v5 = vpop.permute.xlu0 %2048 }
 0x689   : > { %v1585_v23 = vrot.slane %v1584_v22, 1  ;;  %v2054_v7 = vsel %vm1058_vm2, %v2049_v5, 0 }
 0x68b   : > { %v1586_v24 = vadd.f32 %v1585_v23, %v1584_v22 }
 0x68c   : > { %v2159_v9 = vpop.permute.xlu0 %2158 }
 0x68d   : > { %3066 = vpush %v1586_v24  ;;  %v2164_v11 = vsel %vm1058_vm2, %v2159_v9, 0  ;;  %v2790_v24 = vld [vmem:[%s4171_s17] ss:$0 sm:$0xff] }
 0x6be   : > { %s3067_s4 = spop %3066 }
 0x6bf   : > { %s1590_s20 = smul.f32 0.00390625, %s3067_s4  ;;  %s1613_s4 = sld [smem:[#allocation3 + %s3709_s18]] }
 0x6c1   : > { %v1591_v25 = vstv %s1590_s20 }
 0x6c2   : > { %v1592_v26 = vsub.f32 %v1577_v14, %v1591_v25  ;;  %v1615_v14 = vand.u32 127, %v1614_v13 }
 0x6c4   : > { %v1593_v27 = vmul.f32 %v1592_v26, %v1592_v26 }
 0x6c5   : > { %v1616_v15 = vstv %s1613_s4 }
 0x6c6   : > { %v1594_v8 = vsel %vm889_vm1, %v1593_v27, 0.0  ;;  %vm1617_vm7 = vcmp.lt.s32.totalorder %v1615_v14, %v1616_v15 }
 0x6c7   : > { %1595 = vadd.xlane.f32.xlu1 %v1594_v8  ;;  %v1618_v17 = vsel %vm1617_vm7, 0.0, %v3558_v16 }
 0x750   : > { %v1596_v34 = vpop.xlane.xlu1 %1595 }
 0x751   : > { %v1597_v35 = vrot.slane %v1596_v34, 4 }
 0x753   : > { %v1598_v36 = vadd.f32 %v1597_v35, %v1596_v34 }
 0x755   : > { %v1599_v37 = vrot.slane %v1598_v36, 2 }
 0x757   : > { %v1600_v39 = vadd.f32 %v1599_v37, %v1598_v36 }
 0x759   : > { %v1601_v40 = vrot.slane %v1600_v39, 1 }
 0x75b   : > { %v1602_v41 = vadd.f32 %v1601_v40, %v1600_v39 }
 0x75d   : > { %3068 = vpush %v1602_v41 }
 0x78e   : > { %s3069_s3 = spop %3068 }
 0x78f   : > { %s1606_s24 = smul.f32 0.00390625, %s3069_s3 }
 0x791   : > { %s1607_s25 = sadd.f32 1e-05, %s1606_s24  ;;  %s4249_s24 = smov 24  }
 0x793   : > { %v1608_v42 = vstv %s1607_s25 }
 0x794   : > { %3244 = vrsqrt.f32 %v1608_v42 }
 0x7a1   : > { %v3245_v43 = vpop.eup %3244 }
 0x7a2   : > { %3070 = vpush %v3245_v43 }
 0x7d3   : > { %s3071_s28 = spop %3070 }
 0x7d4   : > { %v1611_v44 = vstv %s3071_s28 }
 0x7d5   : > { %v3991_v45 = vmul.f32 %v1611_v44, %v1592_v26 }
 0x7d7   : > { %v1639_v46 = vpack.c.bf16 %v3991_v45, %v3991_v45 }
 0x7d9   : > { %2971 = vmatmul.mubr.msk.bf16.vlgmr.msra.gmra.mxu0 %vm889_vm1, %v1639_v46 }
 0x7da   : > { %2986 = vmatprep.mubr.msk.bf16.mxu0 %vm3551_vm0, %v3550_v0  ;;  %2983 = vmatpush3.bf16.msra.mxu0 %v3218_v3 }
 0x7db   : > { %2984 = vmatprep.subr.bf16.mxu0 %v3550_v0 }
 0x7de   : > { %2985 = vmatpush3.bf16.msra.mxu0 %v3219_v4 }
 0x7df   : > { %2996 = vmatprep.subr.bf16.mxu0 %v3550_v0 }
 0x7e1   : > { %2987 = vmatmul.mubr.msk.bf16.vlgmr.msra.gmra.mxu0 %vm889_vm1, %v3980_v33 }
 0x7e2   : > { %2998 = vmatprep.mubr.msk.bf16.mxu0 %vm3551_vm0, %v3550_v0 }
 0x899   : > { %v1696_v57 = vpop.f32.mrf.mxu0 }
 0x89a   : > { %v1697_v58 = vadd.f32 %v2782_v56, %v1696_v57 }
 0x89b   : > { %v2972_v59 = vpop.f32.mrf.mxu0 }
 0x89c   : > { %v1823_v60 = vmul.f32 0.35355338, %v1697_v58 }
 0x89d   : > { %v1699_v61 = vpop.f32.mrf.mxu0 }
 0x89e   : > { %v1824_v63 = vpack.c.bf16 %v1823_v60, %v1823_v60 }
 0x89f   : > { %v2973_v2 = vpop.f32.mrf.mxu0 }
 0x8a0   : > { %1934 = vrot.lane.b32.xlu1 %v1824_v63, %s3553_s13  ;;  %2993 = vmatmul.mubr.msk.bf16.vlgmr.msra.gmra.mxu1 %vm1058_vm2, %v1824_v63 }
 0x8a1   : > { %3003 = vmatpush3.bf16.xpose.msra.mxu1 %v1943_v1  ;;  %3004 = vmatprep.mubr.msk.bf16.mxu1 %vm3551_vm0, %v3550_v0  ;;  %v1816_v25 = vpop.f32.mrf.mxu0 }
 0x8a2   : > { %3014 = vmatprep.subr.bf16.mxu1 %v3550_v0  ;;  %v1817_v27 = vadd.f32 %v2790_v24, %v1816_v25 }
 0x8a3   : > { %v2988_v26 = vpop.f32.mrf.mxu0 }
 0x8a4   : > { %2046 = vrot.lane.b32.xlu1 %v1824_v63, %s3552_s11 }
 0x8a5   : > { %v1819_v8 = vpop.f32.mrf.mxu0 }
 0x8a6   : > { %v1820_v28 = vadd.f32 %v2790_v24, %v1819_v8 }
 0x8a7   : > { %v2989_v29 = vpop.f32.mrf.mxu0 }
 0x8a8   : > { %2156 = vrot.lane.b32.xlu1 %v1824_v63, %s3554_s15  ;;  %v1826_v30 = vpack.c.bf16 %v1820_v28, %v1817_v27 }
 0x8aa   : > { %v1891_v31 = vsel %vm1889_vm9, %v1826_v30, 0 }
 0x8ab   : > { %2997 = vmatpush3.bf16.msra.mxu0 %v1891_v31 }
 0x8ac   : > { %3008 = vmatprep.subr.bf16.mxu0 %v3550_v0 }
 0x912   : > { %v1935_v6 = vpop.permute.xlu1 %1934 }
 0x913   : > { %3005 = vmatmul.mubr.msk.bf16.vlgmr.msra.gmra.mxu1 %vm1058_vm2, %v1935_v6 }
 0x914   : > { %3015 = vmatpush3.bf16.xpose.msra.mxu1 %v2054_v7  ;;  %3016 = vmatprep.mubr.msk.bf16.mxu1 %vm3551_vm0, %v3550_v0 }
 0x915   : > { %3026 = vmatprep.subr.bf16.mxu1 %v3550_v0 }
 0x916   : > { %v2047_v10 = vpop.permute.xlu1 %2046 }
 0x91a   : > { %v2157_v12 = vpop.permute.xlu1 %2156 }
 0x91b   : > { %3017 = vmatmul.mubr.msk.bf16.vlgmr.msra.gmra.mxu1 %vm1058_vm2, %v2047_v10 }
 0x91c   : > { %3027 = vmatpush3.bf16.xpose.msra.mxu1 %v2164_v11  ;;  %3028 = vmatprep.mubr.msk.bf16.mxu1 %vm3551_vm0, %v3550_v0 }
 0x91d   : > { %3038 = vmatprep.subr.bf16.mxu1 %v3550_v0 }
 0x923   : > { %3029 = vmatmul.mubr.msk.bf16.vlgmr.msra.gmra.mxu1 %vm1058_vm2, %v2157_v12 }
 0x924   : > { %3042 = vmatprep.mubr.msk.bf16.mxu1 %vm3551_vm0, %v3550_v0 }
 0x960   : > { %v1867_v18 = vpop.f32.mrf.mxu1 }
 0x961   : > { %v1868_v19 = vadd.f32 %v1867_v18, %v1618_v17 }
 0x962   : > { %v2994_v20 = vpop.f32.mrf.mxu1 }
 0x963   : > { %v1874_v21 = vsel %vm1873_vm8, %v1868_v19, -inf }
 0x964   : > { %1875 = vmax.xlane.f32.xlu0 %v1874_v21  ;;  %v1870_v22 = vpop.f32.mrf.mxu1 }
 0x966   : > { %v2995_v23 = vpop.f32.mrf.mxu1 }
 0x9d3   : > { %v1979_v32 = vpop.f32.mrf.mxu1 }
 0x9d4   : > { %v1980_v33 = vadd.f32 %v1979_v32, %v1618_v17 }
 0x9d5   : > { %v3006_v34 = vpop.f32.mrf.mxu1 }
 0x9d6   : > { %v1985_v35 = vsel %vm1873_vm8, %v1980_v33, -inf }
 0x9d7   : > { %1986 = vmax.xlane.f32.xlu1 %v1985_v35  ;;  %v1982_v36 = vpop.f32.mrf.mxu1 }
 0x9d9   : > { %v3007_v37 = vpop.f32.mrf.mxu1 }
 0x9db   : > { %v2090_v38 = vpop.f32.mrf.mxu1 }
 0x9dc   : > { %v2091_v39 = vadd.f32 %v2090_v38, %v1618_v17 }
 0x9dd   : > { %v3018_v40 = vpop.f32.mrf.mxu1 }
 0x9de   : > { %v2096_v41 = vsel %vm1873_vm8, %v2091_v39, -inf }
 0x9df   : > { %2097 = vmax.xlane.f32.xlu0 %v2096_v41  ;;  %v2093_v42 = vpop.f32.mrf.mxu1 }
 0x9e1   : > { %v3019_v43 = vpop.f32.mrf.mxu1 }
 0x9e3   : > { %v2200_v44 = vpop.f32.mrf.mxu1 }
 0x9e4   : > { %v2201_v46 = vadd.f32 %v2200_v44, %v1618_v17 }
 0x9e5   : > { %v3030_v47 = vpop.f32.mrf.mxu1 }
 0x9e6   : > { %v2206_v48 = vsel %vm1873_vm8, %v2201_v46, -inf }
 0x9e7   : > { %2207 = vmax.xlane.f32.xlu0 %v2206_v48  ;;  %v2203_v49 = vpop.f32.mrf.mxu1 }
 0x9e9   : > { %v3031_v50 = vpop.f32.mrf.mxu1 }
 0x9ed   : > { %v1876_v51 = vpop.xlane.xlu0 %1875 }
 0x9ee   : > { %v1877_v52 = vsub.f32 %v1868_v19, %v1876_v51 }
 0x9f0   : > { %v1878_v53 = vmul.f32 1.442695, %v1877_v52 }
 0x9f2   : > { %3246 = vpow2.f32 %v1878_v53 }
 0x9ff   : > { %v3247_v54 = vpop.eup %3246 }
 0xa00   : > { %v1880_v55 = vsel %vm1873_vm8, %v3247_v54, 0.0 }
 0xa01   : > { %1881 = vadd.xlane.f32.xlu1 %v1880_v55 }
 0xa12   : > { %1998 = vrot.lane.b32.xlu1 %v1826_v30, %s3553_s13  ;;  %s2817_s13 = sshll.u32 %s3709_s18, 7 }
 0xa60   : > { %v1987_v56 = vpop.xlane.xlu1 %1986 }
 0xa61   : > { %v1988_v57 = vsub.f32 %v1980_v33, %v1987_v56  ;;  %v2802_v56 = vld [vmem:[%s4173_s19] ss:$0 sm:$0xff] }
 0xa63   : > { %v1989_v58 = vmul.f32 1.442695, %v1988_v57 }
 0xa65   : > { %3248 = vpow2.f32 %v1989_v58 }
 0xa68   : > { %v2098_v59 = vpop.xlane.xlu0 %2097 }
 0xa69   : > { %v2099_v60 = vsub.f32 %v2091_v39, %v2098_v59 }
 0xa6b   : > { %v2100_v61 = vmul.f32 1.442695, %v2099_v60 }
 0xa6d   : > { %3250 = vpow2.f32 %v2100_v61 }
 0xa70   : > { %v2208_v62 = vpop.xlane.xlu0 %2207 }
 0xa71   : > { %v2209_v63 = vsub.f32 %v2201_v46, %v2208_v62 }
 0xa72   : > { %v3249_v1 = vpop.eup %3248 }
 0xa73   : > { %v2210_v2 = vmul.f32 1.442695, %v2209_v63  ;;  %v1991_v3 = vsel %vm1873_vm8, %v3249_v1, 0.0 }
 0xa74   : > { %1992 = vadd.xlane.f32.xlu0 %v1991_v3 }
 0xa75   : > { %3252 = vpow2.f32 %v2210_v2 }
 0xa7a   : > { %v3251_v4 = vpop.eup %3250 }
 0xa7b   : > { %v2102_v5 = vsel %vm1873_vm8, %v3251_v4, 0.0 }
 0xa7c   : > { %2103 = vadd.xlane.f32.xlu1 %v2102_v5 }
 0xa82   : > { %v3253_v6 = vpop.eup %3252 }
 0xa83   : > { %v2212_v7 = vsel %vm1873_vm8, %v3253_v6, 0.0 }
 0xa84   : > { %2213 = vadd.xlane.f32.xlu0 %v2212_v7 }
 0xa8a   : > { %v1882_v9 = vpop.xlane.xlu1 %1881 }
 0xa8b   : > { %3254 = vrcp.f32 %v1882_v9 }
 0xa8d   : > { %2218 = vrot.lane.b32.xlu1 %v1826_v30, %s3554_s15  ;;  %s4248_s15 = sld [smem:[#allocation43_spill]] }
 0xa8e   : > { %v1999_v11 = vpop.permute.xlu1 %1998 }
 0xa8f   : > { %v2004_v14 = vsel %vm1889_vm9, %v1999_v11, 0 }
 0xa93   : > { %v3220_v34 = vld [vmem:[%s4248_s15 + $0x8] sm:$0xff]   ;;  %v3221_v37 = vld [vmem:[%s4248_s15] sm:$0xff]  }
 0xa94   : > { %3039 = vmatpush3.bf16.msra.mxu1 %v3220_v34 }
 0xa95   : > { %3040 = vmatprep.subr.bf16.mxu1 %v3550_v0 }
 0xa98   : > { %v3255_v10 = vpop.eup %3254  ;;  %3041 = vmatpush3.bf16.msra.mxu1 %v3221_v37 }
 0xa99   : > { %v1884_v12 = vmul.f32 %v3255_v10, %v3247_v54  ;;  %3054 = vmatprep.subr.bf16.mxu1 %v3550_v0 }
 0xa9a   : > { %2108 = vrot.lane.b32.xlu0 %v1826_v30, %s3552_s11 }
 0xa9b   : > { %v1885_v13 = vpack.c.bf16 %v1884_v12, %v1884_v12  ;;  %v3222_v12 = vld [vmem:[#allocation15 + $0x8] sm:$0xff]  }
 0xa9d   : > { %2999 = vmatmul.mubr.msk.bf16.vlgmr.msra.gmra.mxu0 %vm1873_vm8, %v1885_v13 }
 0xa9e   : > { %3009 = vmatpush3.bf16.msra.mxu0 %v2004_v14  ;;  %3010 = vmatprep.mubr.msk.bf16.mxu0 %vm3551_vm0, %v3550_v0 }
 0xa9f   : > { %3020 = vmatprep.subr.bf16.mxu0 %v3550_v0 }
 0xafd   : > { %v1993_v15 = vpop.xlane.xlu0 %1992 }
 0xafe   : > { %3256 = vrcp.f32 %v1993_v15 }
 0xb05   : > { %v2104_v16 = vpop.xlane.xlu1 %2103 }
 0xb06   : > { %3258 = vrcp.f32 %v2104_v16 }
 0xb09   : > { %v2219_v25 = vpop.permute.xlu1 %2218 }
 0xb0a   : > { %v2224_v27 = vsel %vm1889_vm9, %v2219_v25, 0 }
 0xb0b   : > { %v3257_v17 = vpop.eup %3256 }
 0xb0c   : > { %v1995_v18 = vmul.f32 %v3257_v17, %v3249_v1  ;;  %v3223_v17 = vld [vmem:[#allocation15] sm:$0xff]  }
 0xb0d   : > { %v2214_v19 = vpop.xlane.xlu0 %2213 }
 0xb0e   : > { %3260 = vrcp.f32 %v2214_v19  ;;  %v1996_v20 = vpack.c.bf16 %v1995_v18, %v1995_v18 }
 0xb10   : > { %3011 = vmatmul.mubr.msk.bf16.vlgmr.msra.gmra.mxu0 %vm1873_vm8, %v1996_v20  ;;  %v3224_v20 = vld [vmem:[%s4176_s22 + $0x18] sm:$0xff]  }
 0xb11   : > { %v2109_v21 = vpop.permute.xlu0 %2108  ;;  %3022 = vmatprep.mubr.msk.bf16.mxu0 %vm3551_vm0, %v3550_v0 }
 0xb12   : > { %v2114_v22 = vsel %vm1889_vm9, %v2109_v21, 0 }
 0xb13   : > { %v3259_v23 = vpop.eup %3258  ;;  %3021 = vmatpush3.bf16.msra.mxu0 %v2114_v22  ;;  %v3225_v22 = vld [vmem:[%s4176_s22 + $0x10] sm:$0xff]  }
 0xb14   : > { %3032 = vmatprep.subr.bf16.mxu0 %v3550_v0  ;;  %v2106_v24 = vmul.f32 %v3259_v23, %v3251_v4 }
 0xb16   : > { %v2107_v26 = vpack.c.bf16 %v2106_v24, %v2106_v24 }
 0xb18   : > { %3023 = vmatmul.mubr.msk.bf16.vlgmr.msra.gmra.mxu0 %vm1873_vm8, %v2107_v26 }
 0xb19   : > { %3033 = vmatpush3.bf16.msra.mxu0 %v2224_v27  ;;  %3034 = vmatprep.mubr.msk.bf16.mxu0 %vm3551_vm0, %v3550_v0 }
 0xb1a   : > { %3046 = vmatprep.subr.bf16.mxu0 %v3550_v0 }
 0xb1b   : > { %v3261_v8 = vpop.eup %3260 }
 0xb1c   : > { %v2216_v28 = vmul.f32 %v3261_v8, %v3253_v6  ;;  %v3226_v8 = vld [vmem:[%s4176_s22 + $0x8] sm:$0xff]  }
 0xb1e   : > { %v2217_v29 = vpack.c.bf16 %v2216_v28, %v2216_v28  ;;  %v3227_v28 = vld [vmem:[%s4176_s22] sm:$0xff]  }
 0xb20   : > { %3035 = vmatmul.mubr.msk.bf16.vlgmr.msra.gmra.mxu0 %vm1873_vm8, %v2217_v29  ;;  %v2806_v29 = vld [vmem:[%s4175_s21] ss:$0 sm:$0xff] }
 0xb21   : > { %3050 = vmatprep.mubr.msk.bf16.mxu0 %vm3551_vm0, %v3550_v0  ;;  %3047 = vmatpush3.bf16.msra.mxu0 %v3222_v12 }
 0xb22   : > { %3048 = vmatprep.subr.bf16.mxu0 %v3550_v0 }
 0xb25   : > { %3049 = vmatpush3.bf16.msra.mxu0 %v3223_v17 }
 0xb5d   : > { %v1927_v30 = vpop.f32.mrf.mxu0 }
 0xb5f   : > { %v3000_v31 = vpop.f32.mrf.mxu0 }
 0xb61   : > { %v1930_v32 = vpop.f32.mrf.mxu0 }
 0xb63   : > { %v3001_v33 = vpop.f32.mrf.mxu0 }
 0xbd0   : > { %v2040_v35 = vpop.f32.mrf.mxu0 }
 0xbd1   : > { %2267 = vrot.lane.b32.xlu1 %v2040_v35, %s3555_s6 }
 0xbd2   : > { %v3012_v36 = vpop.f32.mrf.mxu0 }
 0xbd4   : > { %v2043_v38 = vpop.f32.mrf.mxu0 }
 0xbd6   : > { %v3013_v39 = vpop.f32.mrf.mxu0 }
 0xbd8   : > { %v2150_v40 = vpop.f32.mrf.mxu0 }
 0xbd9   : > { %2271 = vrot.lane.b32.xlu0 %v2150_v40, %s3556_s7 }
 0xbda   : > { %v3024_v41 = vpop.f32.mrf.mxu0 }
 0xbdc   : > { %v2153_v42 = vpop.f32.mrf.mxu0 }
 0xbde   : > { %v3025_v43 = vpop.f32.mrf.mxu0 }
 0xbe0   : > { %v2260_v44 = vpop.f32.mrf.mxu0 }
 0xbe1   : > { %2275 = vrot.lane.b32.xlu1 %v2260_v44, %s4249_s24 }
 0xbe2   : > { %v3036_v46 = vpop.f32.mrf.mxu0 }
 0xbe4   : > { %v2263_v47 = vpop.f32.mrf.mxu0 }
 0xbe6   : > { %v3037_v48 = vpop.f32.mrf.mxu0 }
 0xc43   : > { %v2268_v49 = vpop.permute.xlu1 %2267 }
 0xc44   : > { %v2278_v51 = vsel %vm1058_vm2, %v1927_v30, %v2268_v49 }
 0xc4b   : > { %v2272_v50 = vpop.permute.xlu0 %2271 }
 0xc4c   : > { %v2279_v52 = vsel %vm1511_vm5, %v2278_v51, %v2272_v50 }
 0xc53   : > { %v2276_v53 = vpop.permute.xlu1 %2275 }
 0xc54   : > { %v2280_v54 = vsel %vm1513_vm6, %v2279_v52, %v2276_v53 }
 0xc55   : > { %v2281_v55 = vpack.c.bf16 %v2280_v54, %v2280_v54 }
 0xc57   : > { %3043 = vmatmul.mubr.msk.bf16.vlgmr.msra.gmra.mxu1 %vm889_vm1, %v2281_v55 }
 0xc58   : > { %3062 = vmatprep.mubr.msk.bf16.mxu1 %vm3551_vm0, %v3550_v0  ;;  %3055 = vmatpush3.bf16.msra.mxu1 %v3224_v20 }
 0xc59   : > { %3056 = vmatprep.subr.bf16.mxu1 %v3550_v0 }
 0xc5c   : > { %3057 = vmatpush3.bf16.msra.mxu1 %v3225_v22 }
 0xc5d   : > { %3058 = vmatprep.subr.bf16.mxu1 %v3550_v0 }
 0xc60   : > { %3059 = vmatpush3.bf16.msra.mxu1 %v3226_v8 }
 0xc61   : > { %3060 = vmatprep.subr.bf16.mxu1 %v3550_v0  ;;  %v2810_v0 = vld [vmem:[%s4177_s23] ss:$0 sm:$0xff] }
 0xc64   : > { %3061 = vmatpush3.bf16.msra.mxu1 %v3227_v28 }
 0xd17   : > { %v2337_v57 = vpop.f32.mrf.mxu1 }
 0xd18   : > { %v2338_v58 = vadd.f32 %v2802_v56, %v2337_v57 }
 0xd19   : > { %v3044_v59 = vpop.f32.mrf.mxu1 }
 0xd1a   : > { %v2343_v60 = vadd.f32 %v2338_v58, %v3991_v45 }
 0xd1b   : > { %v2340_v61 = vpop.f32.mrf.mxu1 }
 0xd1c   : > { %v2344_v62 = vsel %vm889_vm1, %v2343_v60, 0.0 }
 0xd1d   : > { %2345 = vadd.xlane.f32.xlu0 %v2344_v62  ;;  %v3045_v63 = vpop.f32.mrf.mxu1 }
 0xda6   : > { %v2346_v1 = vpop.xlane.xlu0 %2345 }
 0xda7   : > { %v2347_v2 = vrot.slane %v2346_v1, 4 }
 0xda9   : > { %v2348_v3 = vadd.f32 %v2347_v2, %v2346_v1 }
 0xdab   : > { %v2349_v4 = vrot.slane %v2348_v3, 2 }
 0xdad   : > { %v2350_v5 = vadd.f32 %v2349_v4, %v2348_v3 }
 0xdaf   : > { %v2351_v6 = vrot.slane %v2350_v5, 1 }
 0xdb1   : > { %v2352_v7 = vadd.f32 %v2351_v6, %v2350_v5 }
 0xdb3   : > { %3072 = vpush %v2352_v7 }
 0xde4   : > { %s3073_s25 = spop %3072 }
 0xde5   : > { %s2356_s28 = smul.f32 0.00390625, %s3073_s25  ;;  %s4251_s25 = sld [smem:[#allocation45_spill]] }
 0xde7   : > { %v2357_v9 = vstv %s2356_s28 }
 0xde8   : > { %v2358_v10 = vsub.f32 %v2343_v60, %v2357_v9 }
 0xdea   : > { %v2359_v11 = vmul.f32 %v2358_v10, %v2358_v10 }
 0xdeb   : > { %s2580_s28 = scalar_lea.hbm %s4251_s25, %s2817_s13 }
 0xdec   : > { %v2360_v45 = vsel %vm889_vm1, %v2359_v11, 0.0 }
 0xded   : > { %2361 = vadd.xlane.f32.xlu1 %v2360_v45 }
 0xe76   : > { %v2362_v13 = vpop.xlane.xlu1 %2361 }
 0xe77   : > { %v2363_v14 = vrot.slane %v2362_v13, 4 }
 0xe79   : > { %v2364_v15 = vadd.f32 %v2363_v14, %v2362_v13 }
 0xe7b   : > { %v2365_v16 = vrot.slane %v2364_v15, 2 }
 0xe7d   : > { %v2366_v18 = vadd.f32 %v2365_v16, %v2364_v15 }
 0xe7f   : > { %v2367_v19 = vrot.slane %v2366_v18, 1 }
 0xe81   : > { %v2368_v21 = vadd.f32 %v2367_v19, %v2366_v18 }
 0xe83   : > { %3074 = vpush %v2368_v21 }
 0xeb4   : > { %s3075_s4 = spop %3074 }
 0xeb5   : > { %s2372_s20 = smul.f32 0.00390625, %s3075_s4 }
 0xeb7   : > { %s2373_s0 = sadd.f32 1e-05, %s2372_s20 }
 0xeb8   : > { %s4250_s20 = sld [smem:[#allocation28_spill]] }
 0xeb9   : > { %v2374_v23 = vstv %s2373_s0  ;;  %s826_s0 = sand.u32 1, %s3530_s29  }
 0xeba   : > { %3262 = vrsqrt.f32 %v2374_v23 }
 0xebe   : > { %p4252_p13 = scmp.ne.s32.totalorder %s4250_s20, 0 }
 0xec7   : > { %v3263_v24 = vpop.eup %3262 }
 0xec8   : > { %3076 = vpush %v3263_v24 }
 0xef9   : > { %s3077_s11 = spop %3076 }
 0xefa   : > { %v2377_v25 = vstv %s3077_s11  ;;  %s2752_s11 = sshll.u32 %s826_s0, 3 }
 0xefb   : > { %v2378_v26 = vmul.f32 %v2377_v25, %v2358_v10  ;;  %s828_s26 = scalar_lea.vmem [#allocation16], %s2752_s11 }
 0xefc   : > { %s2582_s3 = sshll.u32 %s828_s26, 4  ;;  %s2583_s3 = int_to_ptr.vmem [resolvable:$true] %s2582_s3 }
 0xefd   : > { %v2379_v27 = vpack.c.bf16 %v2378_v26, %v2378_v26 }
 0xeff   : > { %3051 = vmatmul.mubr.msk.bf16.vlgmr.msra.gmra.mxu0 %vm889_vm1, %v2379_v27 }
 0xfbf   : > { %v2440_v30 = vpop.f32.mrf.mxu0 }
 0xfc0   : > { %v2441_v31 = vadd.f32 %v2806_v29, %v2440_v30 }
 0xfc1   : > { %v3052_v32 = vpop.f32.mrf.mxu0 }
 0xfc2   : > { %v2446_v33 = vmax.f32 %v2441_v31, 0.0 }
 0xfc3   : > { %v2443_v34 = vpop.f32.mrf.mxu0 }
 0xfc4   : > { %v2447_v35 = vpack.c.bf16 %v2446_v33, %v2446_v33 }
 0xfc5   : > { %v3053_v36 = vpop.f32.mrf.mxu0 }
 0xfc6   : > { %3063 = vmatmul.mubr.msk.bf16.vlgmr.msra.gmra.mxu1 %vm2487_vm10, %v2447_v35 }
0x1086   : > { %v2525_v37 = vpop.f32.mrf.mxu1 }
0x1087   : > { %v2526_v38 = vadd.f32 %v2810_v0, %v2525_v37 }
0x1088   : > { %v3064_v39 = vpop.f32.mrf.mxu1 }
0x1089   : > { %v2531_v40 = vadd.f32 %v2526_v38, %v2378_v26 }
0x108a   : > { %v2528_v41 = vpop.f32.mrf.mxu1 }
0x108b   : > { %v2532_v42 = vsel %vm889_vm1, %v2531_v40, 0.0 }
0x108c   : > { %2533 = vadd.xlane.f32.xlu0 %v2532_v42  ;;  %v3065_v43 = vpop.f32.mrf.mxu1 }
0x1115   : > { %v2534_v44 = vpop.xlane.xlu0 %2533 }
0x1116   : > { %v2535_v46 = vrot.slane %v2534_v44, 4 }
0x1118   : > { %v2536_v47 = vadd.f32 %v2535_v46, %v2534_v44 }
0x111a   : > { %v2537_v48 = vrot.slane %v2536_v47, 2 }
0x111c   : > { %v2538_v49 = vadd.f32 %v2537_v48, %v2536_v47 }
0x111e   : > { %v2539_v50 = vrot.slane %v2538_v49, 1 }
0x1120   : > { %v2540_v51 = vadd.f32 %v2539_v50, %v2538_v49 }
0x1122   : > { %3078 = vpush %v2540_v51 }
0x1153   : > { %s3079_s27 = spop %3078 }
0x1154   : > { %s2544_s8 = smul.f32 0.00390625, %s3079_s27  ;;  %s2569_s27 = scalar_lea.sflag [#allocation6], %s826_s0 }
0x1156   : > { %v2545_v52 = vstv %s2544_s8  ;;  %s3460_s8 = scalar_lea.vmem %s2583_s3, 128 }
0x1157   : > { %v2546_v53 = vsub.f32 %v2531_v40, %v2545_v52  ;;  %p3461_p12 = scmp.ne.s32.totalorder %s2583_s3, %s3460_s8 }
0x1159   : > { %v2547_v54 = vmul.f32 %v2546_v53, %v2546_v53  ;;  %p3462_p2 = pnand %p3461_p12, %p4252_p13 }
0x115b   : > { %v2548_v55 = vsel %vm889_vm1, %v2547_v54, 0.0  ;;  %p3463_p5 = pneg %p3462_p2 }
0x115c   : > { %2549 = vadd.xlane.f32.xlu0 %v2548_v55 }
0x11e5   : > { %v2550_v56 = vpop.xlane.xlu0 %2549 }
0x11e6   : > { %v2551_v57 = vrot.slane %v2550_v56, 4 }
0x11e8   : > { %v2552_v58 = vadd.f32 %v2551_v57, %v2550_v56 }
0x11ea   : > { %v2553_v59 = vrot.slane %v2552_v58, 2 }
0x11ec   : > { %v2554_v60 = vadd.f32 %v2553_v59, %v2552_v58 }
0x11ee   : > { %v2555_v61 = vrot.slane %v2554_v60, 1 }
0x11f0   : > { %v2556_v62 = vadd.f32 %v2555_v61, %v2554_v60 }
0x11f2   : > { %3080 = vpush %v2556_v62 }
0x1223   : > { %s3081_s30 = spop %3080 }
0x1224   : > { %s2560_s2 = smul.f32 0.00390625, %s3081_s30  ;;  %s3559_s30 = smov [#allocation16]  }
0x1225   : > { %s3464_s18 = sshll.u32 %s3559_s30, 4  ;;  %s3465_s18 = int_to_ptr.vmem [resolvable:$false] %s3464_s18 }
0x1226   : > { %s2561_s4 = sadd.f32 1e-05, %s2560_s2  ;;  %s3466_s2 = scalar_lea.vmem %s3465_s18, 256 }
0x1227   : > { %p3467_p6 = scmp.lt.s32.totalorder %s2583_s3, %s3465_s18  ;;  %p3468_p7 = scmp.lt.s32.totalorder %s3466_s2, %s3460_s8 }
0x1228   : > { %v2562_v63 = vstv %s2561_s4 }
0x1229   : > { %3264 = vrsqrt.f32 %v2562_v63  ;;  %p3469_p4 = por %p3468_p7, %p3467_p6 }
0x122b   : > { %p3470_p0 = pnand %p3469_p4, %p3463_p5 }
0x1236   : > { %v3265_v1 = vpop.eup %3264 }
0x1237   : > { %3082 = vpush %v3265_v1 }
0x1268   : > { %s3083_s24 = spop %3082 }
0x1269   : > { %v2565_v2 = vstv %s3083_s24 }
0x126a   : > { %v2566_v3 = vmul.f32 %v2565_v2, %v2546_v53 }
0x126c   : > { %2567 = vst.msk [vmem:[%s828_s26] sm:$0xff] %vm889_vm1, %v2566_v3 }
0x126d   : > { %3473 = shalt.err (!%p3470_p0)
}
0x126e   : > { %s3474_s4 = scalar_lea.hbm %s2580_s28, 128  ;;  %s3478_s13 = scalar_lea.hbm %s4251_s25, 256 }
0x126f   : > { %p3475_p8 = scmp.ne.s32.totalorder %s2580_s28, %s3474_s4  ;;  %p3479_p11 = scmp.lt.s32.totalorder %s2580_s28, %s4251_s25 }
0x1270   : > { %p3480_p1 = scmp.lt.s32.totalorder %s3478_s13, %s3474_s4 }
0x1271   : > { %p3476_p10 = pnand %p3475_p8, %p4252_p13 }
0x1272   : > { %p3481_p9 = por %p3480_p1, %p3479_p11 }
0x1273   : > { %p3477_p3 = pneg %p3476_p10 }
0x1275   : > { %p3482_p12 = pnand %p3481_p9, %p3477_p3 }
0x1277   : > { %3485 = shalt.err (!%p3482_p12)
}
0x1278   : > { %3112 = dma.vmem_to_hbm [thread:$0]  (%p4252_p13), %s2583_s3, 128, %s2580_s28, %s2569_s27  }
0x1279 PF: > { %s4253_s6 = sld [smem:[#allocation25_spill]] }
0x127a   : > { %s4254_s7 = sld [smem:[#allocation23_spill]] }
0x127b   : > { %s4255_s8 = sld [smem:[#allocation29_spill]] }
0x127f   : > { %p3154_p2 = scmp.ge.s32.totalorder %s4253_s6, 2 }
0x1280   : > { %s2594_s30 = sand.u32 1, %s4254_s7  }
0x1281   : > { %p4256_p5 = scmp.ne.s32.totalorder %s4255_s8, 0  ;;  %s2595_s18 = scalar_lea.sflag [#allocation6], %s2594_s30 }
0x1283   : > { %p3137_p6 = pnand %p3154_p2, %p4256_p5 }
0x1285   : > { %p3138_p7 = pneg %p3137_p6 }
0x1287   : > { %3521 = dma.done.wait (%p3138_p7), %s2595_s18, 128  }
0x1288   : > { %3523 = vsyncadd (%p3138_p7), %s2595_s18, 4294967168  ;;  %s4257_s7 = sld [smem:[#allocation26_spill]]  ;;  %s4260_s2 = smov %s3530_s29 }
0x1289   : > { %s4258_s4 = sld [smem:[#allocation24_spill]] }
0x128a   : > { %s4259_s0 = sld [smem:[#allocation27_spill]] }
0x128e   : > { %p44_p4 = scmp.ge.s32.totalorder %s4257_s7, 4  }
0x128f   : > { %s4261_s29 = smov %s4258_s4 }
0x1290   :  { %46 = sbr.rel (!%p44_p4) target bundleno = 44 (0x2c), region = 182 }
0x1295   :  { %2600 = vsyncpa [#allocation5], 1 }
0x1296   :  { %2602 = vsyncpa [#allocation5 + $0x1], 1 }
0x1297   :  { %2603 = vsyncpa [#allocation8], 1 }
0x1298   :  { %2604 = vsyncpa [#allocation11], 1 }
0x1299   :  { %2605 = vsyncpa [#allocation14], 1 }
0x129a   :  { %2606 = vsyncpa [#allocation6], 1 }
0x129b   :  { %2608 = vsyncpa [#allocation6 + $0x1], 1 }

</bundles_post_ra>
